<compile_context>
chip_gen: v6e
topology: v6e:2x2x1
jax: 0.10.0
libtpu: 0.0.40
codegen_flags: <defaults>
</compile_context>

<pallas_src>
import jax
import jax.numpy as jnp
from jax import lax
from jax.experimental import pallas as pl
from jax.experimental.pallas import tpu as pltpu


def _fairloss2_kernel(row_ref, col_ref, out_ref, acc_ref):
    i = pl.program_id(0)          # row block
    j = pl.program_id(1)          # col block (reduction axis, innermost)
    tm = row_ref.shape[0]
    tn = col_ref.shape[0]

    @pl.when(j == 0)
    def _():
        acc_ref[...] = jnp.zeros_like(acc_ref)

    # (tm, D) . (tn, D)^T on the MXU, f32 accumulation, no explicit transpose.
    logits = lax.dot_general(
        row_ref[...],
        col_ref[...],
        dimension_numbers=(((1,), (1,)), ((), ())),
        preferred_element_type=jnp.float32,
    )

    @pl.when(i != j)
    def _():
        acc_ref[...] += jnp.abs(logits)

    @pl.when(i == j)
    def _():
        # Diagonal block (tm == tn): zero out the true diagonal exactly.
        r = lax.broadcasted_iota(jnp.int32, (tm, tn), 0)
        c = lax.broadcasted_iota(jnp.int32, (tm, tn), 1)
        acc_ref[...] += jnp.where(r == c, 0.0, jnp.abs(logits))

    @pl.when(j == pl.num_programs(1) - 1)
    def _():
        # One cross-lane reduction per row strip; store lane-dense.
        s = jnp.sum(acc_ref[...])
        out_ref[...] = jnp.broadcast_to(s, out_ref.shape)


def fairloss2(rep, lamda, *, tm=256, compute_dtype=jnp.bfloat16):
    """Pallas implementation of FairLoss2.forward. Returns a float32 scalar.

    rep: (N, D). MXU operands are cast to `compute_dtype` (bf16 by default,
    accumulation always f32). Pass compute_dtype=jnp.float32 for an exact
    f32 path.
    """
    n, d = rep.shape
    tm = int(min(tm, n))
    tn = tm
    assert n % tm == 0, f"N={n} must be divisible by the tile size tm={tm}"
    n_rb = n // tm
    n_cb = n // tn

    rep_c = rep.astype(compute_dtype)
    itemsize = jnp.dtype(compute_dtype).itemsize

    # VMEM estimate: double-buffered input tiles + out block + acc scratch
    # + headroom for the logits temporary.
    vmem_est = (
        2 * (tm + tn) * d * itemsize
        + 2 * 8 * 128 * 4
        + 3 * tm * tn * 4
        + (1 << 20)
    )
    vmem_limit = int(max(vmem_est, 32 * 1024 * 1024))

    partials = pl.pallas_call(
        _fairloss2_kernel,
        out_shape=jax.ShapeDtypeStruct((n_rb, 8, 128), jnp.float32),
        grid_spec=pltpu.PrefetchScalarGridSpec(
            num_scalar_prefetch=0,
            grid=(n_rb, n_cb),
            in_specs=[
                # Row tile: constant across j -> fetched once per row strip.
                pl.BlockSpec((tm, d), lambda i, j: (i, 0)),
                # Column tile: marches down rep with j (pipelined DMA).
                pl.BlockSpec((tn, d), lambda i, j: (j, 0)),
            ],
            out_specs=pl.BlockSpec((1, 8, 128), lambda i, j: (i, 0, 0)),
            scratch_shapes=[pltpu.VMEM((tm, tn), jnp.float32)],
        ),
        compiler_params=pltpu.CompilerParams(
            dimension_semantics=("parallel", "arbitrary"),
            vmem_limit_bytes=vmem_limit,
        ),
    )(rep_c, rep_c)

    # Tiny epilogue in XLA: pick one lane per row block, sum, scale by lamda.
    return jnp.sum(partials[:, 0, 0]) * jnp.float32(lamda)


if __name__ == "__main__":
    key = jax.random.PRNGKey(0)
    N, D = 512, 128      # small "rep" batch of feature vectors (MXU-aligned)
    lamda = 0.5

    rep = jax.random.normal(key, (N, D), dtype=jnp.float32)

    loss = fairloss2(rep, lamda)
    jax.block_until_ready(loss)

    # Reference 1: same precision as the kernel (bf16 operands, f32 accum).
    rep_c = rep.astype(jnp.bfloat16)
    logits = lax.dot_general(
        rep_c, rep_c, (((1,), (1,)), ((), ())),
        preferred_element_type=jnp.float32,
    )
    logits = logits - jnp.diag(jnp.diag(logits))
    ref = jnp.sum(jnp.abs(logits)) * lamda
    rel = jnp.abs(loss - ref) / jnp.abs(ref)
    assert rel < 1e-3, (loss, ref, rel)

    # Reference 2: full-f32 PyTorch-equivalent math (loose tolerance for bf16).
    logits32 = jnp.dot(rep, rep.T, precision=lax.Precision.HIGHEST)
    logits32 = logits32 - jnp.diag(jnp.diag(logits32))
    ref32 = jnp.sum(jnp.abs(logits32)) * lamda
    rel32 = jnp.abs(loss - ref32) / jnp.abs(ref32)
    assert rel32 < 1e-2, (loss, ref32, rel32)

    print("KERNEL_OK")
</pallas_src>

<mosaic_0001>
module attributes {stable_mosaic.version = 11 : i64} {
  func.func @_fairloss2_kernel(%arg0: i32, %arg1: i32, %arg2: memref<256x128xbf16, #tpu.memory_space<vmem>>, %arg3: memref<256x128xbf16, #tpu.memory_space<vmem>>, %arg4: memref<1x8x128xf32, #tpu.memory_space<vmem>>, %arg5: memref<256x256xf32, #tpu.memory_space<vmem>>) attributes {dimension_semantics = [#tpu.dimension_semantics<parallel>, #tpu.dimension_semantics<arbitrary>], iteration_bounds = array<i64: 2, 2>, scalar_prefetch = 0 : i64, scratch_operands = 1 : i64, tpu.core_type = #tpu.core_type<tc>, window_params = [{transform_indices = @transform_0, window_bounds = array<i64: 256, 128>}, {transform_indices = @transform_1, window_bounds = array<i64: 256, 128>}, {transform_indices = @transform_2, window_bounds = array<i64: 1, 8, 128>}]} {
    %c0_i32 = arith.constant 0 : i32
    %0 = arith.cmpi eq, %arg1, %c0_i32 : i32
    %1 = arith.extui %0 : i1 to i32
    %c0_i32_0 = arith.constant 0 : i32
    %2 = arith.cmpi ne, %1, %c0_i32_0 : i32
    scf.if %2 {
      %cst_7 = arith.constant 0.000000e+00 : f32
      %15 = vector.broadcast %cst_7 : f32 to vector<256x256xf32>
      %c0_8 = arith.constant 0 : index
      %c0_9 = arith.constant 0 : index
      %16 = vector.load %arg5[%c0_8, %c0_9] : memref<256x256xf32, #tpu.memory_space<vmem>>, vector<256x256xf32>
      tpu.vector_store %arg5[%c0_8, %c0_9], %15 {strides = array<i32>} : memref<256x256xf32, #tpu.memory_space<vmem>>, vector<256x256xf32>,
    } else {
    }
    %c0 = arith.constant 0 : index
    %c0_1 = arith.constant 0 : index
    %3 = vector.load %arg2[%c0, %c0_1] : memref<256x128xbf16, #tpu.memory_space<vmem>>, vector<256x128xbf16>
    %c0_2 = arith.constant 0 : index
    %c0_3 = arith.constant 0 : index
    %4 = vector.load %arg3[%c0_2, %c0_3] : memref<256x128xbf16, #tpu.memory_space<vmem>>, vector<256x128xbf16>
    %cst = arith.constant dense<0.000000e+00> : vector<256x256xf32>
    %5 = tpu.matmul %3, %4, %cst {dimension_numbers = #tpu.dot_dimension_numbers<[1], [1], [0], [0], [0, 0, 1, 0], [], []>} : vector<256x128xbf16>, vector<256x128xbf16>, vector<256x256xf32> -> vector<256x256xf32>
    %6 = arith.cmpi ne, %arg0, %arg1 : i32
    %7 = arith.extui %6 : i1 to i32
    %c0_i32_4 = arith.constant 0 : i32
    %8 = arith.cmpi ne, %7, %c0_i32_4 : i32
    scf.if %8 {
      %c0_7 = arith.constant 0 : index
      %c0_8 = arith.constant 0 : index
      %15 = vector.load %arg5[%c0_7, %c0_8] : memref<256x256xf32, #tpu.memory_space<vmem>>, vector<256x256xf32>
      %16 = math.absf %5 : vector<256x256xf32>
      %17 = arith.addf %15, %16 : vector<256x256xf32>
      %c0_9 = arith.constant 0 : index
      %c0_10 = arith.constant 0 : index
      %18 = vector.load %arg5[%c0_9, %c0_10] : memref<256x256xf32, #tpu.memory_space<vmem>>, vector<256x256xf32>
      tpu.vector_store %arg5[%c0_9, %c0_10], %17 {strides = array<i32>} : memref<256x256xf32, #tpu.memory_space<vmem>>, vector<256x256xf32>,
    } else {
    }
    %9 = arith.cmpi eq, %arg0, %arg1 : i32
    %10 = arith.extui %9 : i1 to i32
    %c0_i32_5 = arith.constant 0 : i32
    %11 = arith.cmpi ne, %10, %c0_i32_5 : i32
    scf.if %11 {
      %15 = tpu.iota {dimensions = array<i32: 0>} : vector<256x256xi32>
      %16 = tpu.iota {dimensions = array<i32: 1>} : vector<256x256xi32>
      %c0_7 = arith.constant 0 : index
      %c0_8 = arith.constant 0 : index
      %17 = vector.load %arg5[%c0_7, %c0_8] : memref<256x256xf32, #tpu.memory_space<vmem>>, vector<256x256xf32>
      %18 = arith.cmpi eq, %15, %16 : vector<256x256xi32>
      %19 = math.absf %5 : vector<256x256xf32>
      %cst_9 = arith.constant 0.000000e+00 : f32
      %20 = vector.broadcast %cst_9 : f32 to vector<256x256xf32>
      %21 = arith.select %18, %20, %19 : vector<256x256xi1>, vector<256x256xf32>
      %22 = arith.addf %17, %21 : vector<256x256xf32>
      %c0_10 = arith.constant 0 : index
      %c0_11 = arith.constant 0 : index
      %23 = vector.load %arg5[%c0_10, %c0_11] : memref<256x256xf32, #tpu.memory_space<vmem>>, vector<256x256xf32>
      tpu.vector_store %arg5[%c0_10, %c0_11], %22 {strides = array<i32>} : memref<256x256xf32, #tpu.memory_space<vmem>>, vector<256x256xf32>,
    } else {
    }
    %c1_i32 = arith.constant 1 : i32
    %12 = arith.cmpi eq, %arg1, %c1_i32 : i32
    %13 = arith.extui %12 : i1 to i32
    %c0_i32_6 = arith.constant 0 : i32
    %14 = arith.cmpi ne, %13, %c0_i32_6 : i32
    scf.if %14 {
      %c0_7 = arith.constant 0 : index
      %c0_8 = arith.constant 0 : index
      %15 = vector.load %arg5[%c0_7, %c0_8] : memref<256x256xf32, #tpu.memory_space<vmem>>, vector<256x256xf32>
      %16 = vector.shape_cast %15 : vector<256x256xf32> to vector<1x256x256xf32>
      %cst_9 = arith.constant dense<0.000000e+00> : vector<1xf32>
      %17 = vector.multi_reduction <add>, %16, %cst_9 [1, 2] : vector<1x256x256xf32> to vector<1xf32>
      %18 = vector.shape_cast %17 : vector<1xf32> to vector<1x1x1xf32>
      %19 = vector.extract %18[0, 0, 0] : f32 from vector<1x1x1xf32>
      %20 = vector.broadcast %19 : f32 to vector<1x8x128xf32>
      %c0_10 = arith.constant 0 : index
      %c0_11 = arith.constant 0 : index
      %c0_12 = arith.constant 0 : index
      %21 = vector.load %arg4[%c0_10, %c0_11, %c0_12] : memref<1x8x128xf32, #tpu.memory_space<vmem>>, vector<1x8x128xf32>
      tpu.vector_store %arg4[%c0_10, %c0_11, %c0_12], %20 {strides = array<i32>} : memref<1x8x128xf32, #tpu.memory_space<vmem>>, vector<1x8x128xf32>,
    } else {
    }
    return
  }
  func.func @transform_0(%arg0: i32, %arg1: i32) -> (i32, i32) {
    %c0_i32 = arith.constant 0 : i32
    %c0_i32_0 = arith.constant 0 : i32
    return %arg0, %c0_i32 : i32, i32
  }
  func.func @transform_1(%arg0: i32, %arg1: i32) -> (i32, i32) {
    %c0_i32 = arith.constant 0 : i32
    %c0_i32_0 = arith.constant 0 : i32
    return %arg1, %c0_i32 : i32, i32
  }
  func.func @transform_2(%arg0: i32, %arg1: i32) -> (i32, i32, i32) {
    %c0_i32 = arith.constant 0 : i32
    %c0_i32_0 = arith.constant 0 : i32
    %c0_i32_1 = arith.constant 0 : i32
    return %arg0, %c0_i32, %c0_i32_0 : i32, i32, i32
  }
}

</mosaic_0001>

<bundles_post_ra>
// kernel: tpu_custom_call.1
= control target key start
LH: loop header
LB: loop body
LE: loop exit
PB: predicated region body
PF: predicated region fallthrough
CT: control target
= control target key end

     0   :  { %s2827_s0 = inlined_call_operand.hbm [shape: bf16[512,128], index: 0, kind: input, shape index: {}]   ;;  %s2828_s1 = inlined_call_operand.hbm [shape: bf16[512,128], index: 1, kind: input, shape index: {}]   ;;  %s2829_s2 = inlined_call_operand.hbm [shape: f32[2,8,128], index: 2, kind: output, shape index: {}]  }
   0x1   :  { %2847 = sst [smem:[#allocation43_spill]] %s2827_s0 }
   0x2   :  { %7 = vsyncpa [#allocation4], 0 }
   0x3   :  { %9 = vsyncpa [#allocation4 + $0x1], 0 }
   0x4   :  { %10 = vsyncpa [#allocation7], 0 }
   0x5   :  { %12 = vsyncpa [#allocation7 + $0x1], 0 }
   0x6   :  { %13 = vsyncpa [#allocation5], 0 }
   0x7   :  { %15 = vsyncpa [#allocation5 + $0x1], 0  ;;  %s2145_s9 = smov 0   ;;  %s2147_s10 = smov 0  }
   0x8   :  { %s2149_s11 = smov 0   ;;  %s2151_s12 = smov 0  }
   0x9   :  { %s2153_s13 = smov 0   ;;  %s2155_s14 = smov 0  }
   0xa   :  { %s2157_s15 = smov 0   ;;  %s2159_s16 = smov 0  }
   0xb   :  { %s2161_s17 = smov 0   ;;  %s2163_s18 = smov 0  }
   0xc   :  { %s2165_s19 = smov 0  }
   0xd LB: > { %2848 = sst [smem:[#allocation12_spill]] %s2094_s12  ;;  %s1678_s20 = sadd.s32 4294967295, %s2122_s19   ;;  %s2122_s19 = sphi %s2165_s19, %s21_s19   ;;  %s2118_s18 = sphi %s2163_s18, %s2955_s18   ;;  %s2114_s17 = sphi %s2161_s17, %s2954_s17   ;;  %s2110_s16 = sphi %s2159_s16, %s2953_s16   ;;  %s2106_s15 = sphi %s2157_s15, %s2952_s15   ;;  %s2102_s14 = sphi %s2155_s14, %s2951_s14   ;;  %s2098_s13 = sphi %s2153_s13, %s2950_s13   ;;  %s2094_s12 = sphi %s2151_s12, %s2949_s12   ;;  %s2090_s11 = sphi %s2149_s11, %s2948_s11   ;;  %s2086_s10 = sphi %s2147_s10, %s2947_s10   ;;  %s2082_s9 = sphi %s2145_s9, %s2946_s9  }
   0xe   : > { %s1679_s21 = sadd.s32 4294967294, %s2122_s19   ;;  %p47_p0 = scmp.ne.s32.totalorder %s2102_s14, %s2098_s13 }
   0xf   : > { %p2830_p1 = scmp.eq.s32.totalorder %s2122_s19, 0  ;;  %p53_p2 = scmp.ne.s32.totalorder %s2098_s13, %s2094_s12 }
  0x10   : > { %p2209_p3 = scmp.eq.s32.totalorder %s1678_s20, 0  ;;  %p103_p5 = scmp.eq.s32.totalorder %s1678_s20, 3 }
  0x11   : > { %p2215_p4 = por %p2830_p1, %p47_p0  ;;  %p109_p7 = scmp.eq.s32.totalorder %s1679_s21, 3 }
  0x12   : > { %p2221_p6 = por %p2209_p3, %p53_p2  ;;  %p2225_p8 = por %p103_p5, %p47_p0 }
  0x13   : > { %p2229_p9 = por %p109_p7, %p53_p2  ;;  %p1817_p10 = scmp.lt.s32.totalorder %s2122_s19, 4 }
  0x14   : > { %s2852_s27 = scalar_select %p2225_p8, 1, 0 }
  0x15   : > { %s2853_s28 = scalar_select %p2229_p9, 1, 0 }
  0x16   : > { %s129_s29 = sand.u32 1, %s2102_s14   ;;  %s1732_s30 = sshll.u32 %s2118_s18, 11 }
  0x17   : > { %2854 = sst [smem:[#allocation13_spill]] %s2853_s28  ;;  %s1682_s3 = sshll.u32 %s129_s29, 7 }
  0x18   : > { %s2855_s0 = sld [smem:[#allocation43_spill]]  ;;  %s133_s7 = scalar_lea.vmem [#allocation3], %s1682_s3 }
  0x19   : > { %s140_s8 = sshll.u32 %s133_s7, 4  ;;  %p2243_p11 = pnand %p1817_p10, %p2215_p4  ;;  %s141_s8 = int_to_ptr.vmem [resolvable:$true] %s140_s8 }
  0x1a   : > { %s130_s21 = scalar_lea.sflag [#allocation4], %s129_s29  ;;  %s1955_s23 = scalar_lea.vmem %s141_s8, 2048 }
  0x1b   : > { %p1944_p12 = pneg %p2243_p11  ;;  %p1956_p13 = scmp.ne.s32.totalorder %s141_s8, %s1955_s23 }
  0x1c   : > { %s2124_s22 = smov [#allocation3]  }
  0x1d   : > { %p1958_p0 = pnand %p1956_p13, %p1944_p12  ;;  %s1960_s4 = sshll.u32 %s2124_s22, 4  ;;  %s1961_s4 = int_to_ptr.vmem [resolvable:$false] %s1960_s4 }
  0x1e   : > { %s139_s6 = scalar_lea.hbm %s2855_s0, %s1732_s30  ;;  %s1962_s30 = scalar_lea.vmem %s1961_s4, 4096 }
  0x1f   : > { %p1959_p2 = pneg %p1958_p0  ;;  %p1963_p5 = scmp.lt.s32.totalorder %s141_s8, %s1961_s4 }
  0x20   : > { %p1964_p7 = scmp.lt.s32.totalorder %s1962_s30, %s1955_s23 }
  0x22   : > { %p1965_p1 = por %p1964_p7, %p1963_p5 }
  0x24   : > { %p1966_p4 = pnand %p1965_p1, %p1959_p2 }
  0x26   : > { %1969 = shalt.err (!%p1966_p4)
}
  0x27   : > { %s2831_s25 = smov 64   ;;  %s2832_s22 = smov 4  }
  0x28   : > { %1809 = dma.hbm_to_vmem [thread:$0]  (!%p2243_p11), %s139_s6, 2048, %s141_s8, %s130_s21, %s2831_s25, %s2831_s25, %s2832_s22  }
  0x29   : > { %p1688_p1 = scmp.ge.s32.totalorder %s2122_s19, 1  ;;  %p169_p12 = scmp.lt.s32.totalorder %s2122_s19, 5 }
  0x2a   : > { %s30_s29 = sadd.s32 1, %s2114_s17  ;;  %s66_s3 = sadd.s32 1, %s2090_s11 }
  0x2b   : > { %p2256_p13 = pnand %p1688_p1, %p169_p12  ;;  %p31_p0 = scmp.ge.s32.totalorder %s30_s29, 2 }
  0x2c   : > { %p73_p2 = scmp.ne.s32.totalorder %s2090_s11, %s2086_s10  ;;  %p79_p5 = scmp.ne.s32.totalorder %s2086_s10, %s2082_s9 }
  0x2d   : > { %s2957_s29 = smov (%p31_p0, %s30_s29), 0  ;;  %s2859_s5 = sadd.s32 1, %s2118_s18 }
  0x2e   : > { %2858 = sst [smem:[#allocation14_spill]] %s2957_s29  ;;  %s2959_s5 = smov (!%p31_p0, %s2859_s5), %s2118_s18 }
  0x2f   : > { %s63_s6 = ssub.s32 %s2114_s17, %s2957_s29  ;;  %p2860_p11 = scmp.eq.s32.totalorder %s2122_s19, 0 }
  0x30   : > { %p35_p4 = scmp.ge.s32.totalorder %s2959_s5, 2  ;;  %p64_p1 = scmp.eq.s32.totalorder %s63_s6, 0 }
  0x31   : > { %p2275_p7 = por %p73_p2, %p2860_p11  ;;  %p2281_p12 = por %p79_p5, %p2209_p3 }
  0x32   : > { %s150_s9 = sand.u32 1, %s2090_s11   ;;  %s2961_s5 = smov (%p35_p4, %s2959_s5), 0 }
  0x33   : > { %s2289_s20 = scalar_select %p64_p1, %s2090_s11, %s66_s3  }
  0x34   : > { %s37_s21 = ssub.s32 %s2118_s18, %s2961_s5  ;;  %s1685_s4 = sshll.u32 %s150_s9, 7 }
  0x35   : > { %p38_p0 = scmp.eq.s32.totalorder %s37_s21, 0  ;;  %s1733_s30 = sshll.u32 %s2114_s17, 11 }
  0x36   : > { %s2863_s25 = sadd.s32 1, %s2102_s14  ;;  %s160_s24 = scalar_lea.hbm %s2828_s1, %s1733_s30 }
  0x37   : > { %s2297_s22 = scalar_select %p38_p0, %s2102_s14, %s2863_s25  }
  0x38   : > { %s154_s29 = scalar_lea.vmem [#allocation6], %s1685_s4  ;;  %p2306_p3 = pnand %p1817_p10, %p2275_p7 }
  0x39   : > { %s161_s28 = sshll.u32 %s154_s29, 4  ;;  %s151_s3 = scalar_lea.sflag [#allocation7], %s150_s9  ;;  %s162_s28 = int_to_ptr.vmem [resolvable:$true] %s161_s28 }
  0x3a   : > { %p1972_p2 = pneg %p2306_p3  ;;  %s1983_s21 = scalar_lea.vmem %s162_s28, 2048 }
  0x3b   : > { %p1984_p5 = scmp.ne.s32.totalorder %s162_s28, %s1983_s21  ;;  %s2127_s25 = smov [#allocation6]  }
  0x3c   : > { %s1988_s0 = sshll.u32 %s2127_s25, 4  ;;  %s1989_s0 = int_to_ptr.vmem [resolvable:$false] %s1988_s0 }
  0x3d   : > { %p1986_p11 = pnand %p1984_p5, %p1972_p2  ;;  %s1990_s4 = scalar_lea.vmem %s1989_s0, 4096 }
  0x3e   : > { %p1991_p1 = scmp.lt.s32.totalorder %s162_s28, %s1989_s0  ;;  %p1992_p0 = scmp.lt.s32.totalorder %s1990_s4, %s1983_s21 }
  0x3f   : > { %p1987_p4 = pneg %p1986_p11 }
  0x40   : > { %p1993_p9 = por %p1992_p0, %p1991_p1 }
  0x42   : > { %p1994_p8 = pnand %p1993_p9, %p1987_p4 }
  0x44   : > { %1997 = shalt.err (!%p1994_p8)
}
  0x45   : > { %s2865_s29 = smov 4   ;;  %s2866_s7 = smov 64  }
  0x46   : > { %1812 = dma.hbm_to_vmem [thread:$0]  (!%p2306_p3), %s160_s24, 2048, %s162_s28, %s151_s3, %s2866_s7, %s2866_s7, %s2865_s29  }
  0x47   : > { %173 = sbr.rel (%p2256_p13) target bundleno = 928 (0x3a0), region = 28 }
  0x4c   : > { %s2320_s9 = sand.u32 1, %s2098_s13  }
  0x4d   : > { %s1689_s30 = sshll.u32 %s2320_s9, 7  ;;  %s176_s6 = scalar_lea.sflag [#allocation4], %s2320_s9 }
  0x4e   : > { %s2324_s21 = scalar_lea.vmem [#allocation3], %s1689_s30 }
  0x4f   : > { %2069 = dma.done.wait (%p2221_p6), %s176_s6, 2048  }
  0x50   : > { %2071 = vsyncadd (%p2221_p6), %s176_s6, 4294965248  ;;  %s184_s12 = sand.u32 1, %s2086_s10  }
  0x51   : > { %s1690_s28 = sshll.u32 %s184_s12, 7  ;;  %s185_s23 = scalar_lea.sflag [#allocation7], %s184_s12 }
  0x52   : > { %s2331_s24 = scalar_lea.vmem [#allocation6], %s1690_s28 }
  0x53   : > { %2073 = dma.done.wait (%p2281_p12), %s185_s23, 2048  }
  0x54   : > { %2075 = vsyncadd (%p2281_p12), %s185_s23, 4294965248  ;;  %s1691_s3 = sshll.u32 %s2320_s9, 3  ;;  %p1692_p8 = scmp.ne.s32.totalorder %s2106_s15, 0 }
  0x55   : > { %s2338_s25 = scalar_lea.vmem [#allocation8], %s1691_s3 }
  0x56   : > { %220 = sbr.rel (%p1692_p8) target bundleno = 124 (0x7c), region = 40 }
  0x5b   : > { %v2128_v0 = vmov 0.0  }
  0x5c   : > { %221 = vst [vmem:[#allocation2 + $0xb0] sm:$0xff] %v2128_v0  ;;  %222 = vst [vmem:[#allocation2 + $0x1b0] sm:$0xff] %v2128_v0 }
  0x5d   : > { %223 = vst [vmem:[#allocation2 + $0xd8] sm:$0xff] %v2128_v0  ;;  %224 = vst [vmem:[#allocation2 + $0x18] sm:$0xff] %v2128_v0 }
  0x5e   : > { %225 = vst [vmem:[#allocation2 + $0x50] sm:$0xff] %v2128_v0  ;;  %226 = vst [vmem:[#allocation2 + $0x168] sm:$0xff] %v2128_v0 }
  0x5f   : > { %227 = vst [vmem:[#allocation2 + $0x130] sm:$0xff] %v2128_v0  ;;  %228 = vst [vmem:[#allocation2 + $0x48] sm:$0xff] %v2128_v0 }
  0x60   : > { %229 = vst [vmem:[#allocation2 + $0x180] sm:$0xff] %v2128_v0  ;;  %230 = vst [vmem:[#allocation2 + $0x110] sm:$0xff] %v2128_v0 }
  0x61   : > { %231 = vst [vmem:[#allocation2 + $0x118] sm:$0xff] %v2128_v0  ;;  %232 = vst [vmem:[#allocation2 + $0x98] sm:$0xff] %v2128_v0 }
  0x62   : > { %233 = vst [vmem:[#allocation2 + $0x120] sm:$0xff] %v2128_v0  ;;  %234 = vst [vmem:[#allocation2 + $0x150] sm:$0xff] %v2128_v0 }
  0x63   : > { %235 = vst [vmem:[#allocation2 + $0x108] sm:$0xff] %v2128_v0  ;;  %236 = vst [vmem:[#allocation2 + $0x60] sm:$0xff] %v2128_v0 }
  0x64   : > { %237 = vst [vmem:[#allocation2 + $0xe0] sm:$0xff] %v2128_v0  ;;  %238 = vst [vmem:[#allocation2 + $0x188] sm:$0xff] %v2128_v0 }
  0x65   : > { %239 = vst [vmem:[#allocation2 + $0x138] sm:$0xff] %v2128_v0  ;;  %240 = vst [vmem:[#allocation2 + $0x140] sm:$0xff] %v2128_v0 }
  0x66   : > { %241 = vst [vmem:[#allocation2 + $0x80] sm:$0xff] %v2128_v0  ;;  %242 = vst [vmem:[#allocation2 + $0x1a8] sm:$0xff] %v2128_v0 }
  0x67   : > { %243 = vst [vmem:[#allocation2 + $0x1b8] sm:$0xff] %v2128_v0  ;;  %244 = vst [vmem:[#allocation2 + $0x28] sm:$0xff] %v2128_v0 }
  0x68   : > { %245 = vst [vmem:[#allocation2 + $0x1e8] sm:$0xff] %v2128_v0  ;;  %246 = vst [vmem:[#allocation2 + $0xf8] sm:$0xff] %v2128_v0 }
  0x69   : > { %247 = vst [vmem:[#allocation2 + $0x160] sm:$0xff] %v2128_v0  ;;  %248 = vst [vmem:[#allocation2 + $0x30] sm:$0xff] %v2128_v0 }
  0x6a   : > { %249 = vst [vmem:[#allocation2 + $0x1e0] sm:$0xff] %v2128_v0  ;;  %250 = vst [vmem:[#allocation2] sm:$0xff] %v2128_v0 }
  0x6b   : > { %251 = vst [vmem:[#allocation2 + $0xf0] sm:$0xff] %v2128_v0  ;;  %252 = vst [vmem:[#allocation2 + $0x8] sm:$0xff] %v2128_v0 }
  0x6c   : > { %253 = vst [vmem:[#allocation2 + $0x148] sm:$0xff] %v2128_v0  ;;  %254 = vst [vmem:[#allocation2 + $0x1d0] sm:$0xff] %v2128_v0 }
  0x6d   : > { %255 = vst [vmem:[#allocation2 + $0x100] sm:$0xff] %v2128_v0  ;;  %256 = vst [vmem:[#allocation2 + $0xc8] sm:$0xff] %v2128_v0 }
  0x6e   : > { %257 = vst [vmem:[#allocation2 + $0x40] sm:$0xff] %v2128_v0  ;;  %258 = vst [vmem:[#allocation2 + $0x1f8] sm:$0xff] %v2128_v0 }
  0x6f   : > { %259 = vst [vmem:[#allocation2 + $0x20] sm:$0xff] %v2128_v0  ;;  %260 = vst [vmem:[#allocation2 + $0x128] sm:$0xff] %v2128_v0 }
  0x70   : > { %261 = vst [vmem:[#allocation2 + $0x1a0] sm:$0xff] %v2128_v0  ;;  %262 = vst [vmem:[#allocation2 + $0x1f0] sm:$0xff] %v2128_v0 }
  0x71   : > { %263 = vst [vmem:[#allocation2 + $0xe8] sm:$0xff] %v2128_v0  ;;  %264 = vst [vmem:[#allocation2 + $0x78] sm:$0xff] %v2128_v0 }
  0x72   : > { %265 = vst [vmem:[#allocation2 + $0x70] sm:$0xff] %v2128_v0  ;;  %266 = vst [vmem:[#allocation2 + $0x90] sm:$0xff] %v2128_v0 }
  0x73   : > { %267 = vst [vmem:[#allocation2 + $0x1d8] sm:$0xff] %v2128_v0  ;;  %268 = vst [vmem:[#allocation2 + $0xd0] sm:$0xff] %v2128_v0 }
  0x74   : > { %269 = vst [vmem:[#allocation2 + $0xb8] sm:$0xff] %v2128_v0  ;;  %270 = vst [vmem:[#allocation2 + $0x88] sm:$0xff] %v2128_v0 }
  0x75   : > { %271 = vst [vmem:[#allocation2 + $0xa8] sm:$0xff] %v2128_v0  ;;  %272 = vst [vmem:[#allocation2 + $0x1c8] sm:$0xff] %v2128_v0 }
  0x76   : > { %273 = vst [vmem:[#allocation2 + $0x170] sm:$0xff] %v2128_v0  ;;  %274 = vst [vmem:[#allocation2 + $0x178] sm:$0xff] %v2128_v0 }
  0x77   : > { %275 = vst [vmem:[#allocation2 + $0x68] sm:$0xff] %v2128_v0  ;;  %276 = vst [vmem:[#allocation2 + $0x190] sm:$0xff] %v2128_v0 }
  0x78   : > { %277 = vst [vmem:[#allocation2 + $0x198] sm:$0xff] %v2128_v0  ;;  %278 = vst [vmem:[#allocation2 + $0x38] sm:$0xff] %v2128_v0 }
  0x79   : > { %279 = vst [vmem:[#allocation2 + $0xc0] sm:$0xff] %v2128_v0  ;;  %280 = vst [vmem:[#allocation2 + $0x1c0] sm:$0xff] %v2128_v0 }
  0x7a   : > { %281 = vst [vmem:[#allocation2 + $0x158] sm:$0xff] %v2128_v0  ;;  %282 = vst [vmem:[#allocation2 + $0x10] sm:$0xff] %v2128_v0 }
  0x7b   : > { %283 = vst [vmem:[#allocation2 + $0x58] sm:$0xff] %v2128_v0  ;;  %284 = vst [vmem:[#allocation2 + $0xa0] sm:$0xff] %v2128_v0 }
  0x7c PF: > { %v1910_v1 = vld [vmem:[%s2331_s24 + $0x78] sm:$0xff]   ;;  %v1912_v3 = vld [vmem:[%s2331_s24 + $0x70] sm:$0xff]   ;;  %v1914_v5 = vld [vmem:[%s2331_s24 + $0x68] sm:$0xff]   ;;  %p1725_p6 = scmp.eq.s32.totalorder %s2110_s16, %s2106_s15 }
  0x7d   : > { %v1911_v2 = vld [vmem:[%s2331_s24 + $0x38] sm:$0xff]   ;;  %1734 = vmatprep.subr.bf16.mxu0 %v1910_v1  ;;  %1782 = vmatprep.subr.bf16.mxu1 %v1910_v1  ;;  %v1913_v4 = vld [vmem:[%s2331_s24 + $0x30] sm:$0xff]   ;;  %v1915_v6 = vld [vmem:[%s2331_s24 + $0x28] sm:$0xff]  }
  0x7e   : > { %1735 = vmatpush3.bf16.xpose.msra.mxu0 %v1911_v2  ;;  %1790 = vmatpush3.bf16.xpose.msra.mxu1 %v1911_v2  ;;  %v1916_v7 = vld [vmem:[%s2331_s24 + $0x60] sm:$0xff]   ;;  %v1918_v11 = vld [vmem:[%s2331_s24 + $0x58] sm:$0xff]   ;;  %v1920_v13 = vld [vmem:[%s2331_s24 + $0x50] sm:$0xff]  }
  0x7f   : > { %1736 = vmatprep.subr.bf16.mxu0 %v1912_v3  ;;  %1783 = vmatprep.subr.bf16.mxu1 %v1912_v3  ;;  %v1926_v8 = vld [vmem:[%s2324_s21] sm:$0xff]   ;;  %v1919_v12 = vld [vmem:[%s2331_s24 + $0x18] sm:$0xff]   ;;  %v1921_v14 = vld [vmem:[%s2331_s24 + $0x10] sm:$0xff]  }
  0x80   : > { %v1927_v9 = vld [vmem:[%s2324_s21 + $0x40] sm:$0xff]   ;;  %1750 = vmatprep.mubr.bf16.mxu0 %v1926_v8  ;;  %v1922_v15 = vld [vmem:[%s2331_s24 + $0x48] sm:$0xff]   ;;  %v1930_v21 = vld [vmem:[%s2324_s21 + $0x10] sm:$0xff]  }
  0x81   : > { %1766 = vmatprep.mubr.bf16.mxu1 %v1927_v9  ;;  %v1917_v10 = vld [vmem:[%s2331_s24 + $0x20] sm:$0xff]   ;;  %v1923_v16 = vld [vmem:[%s2331_s24 + $0x8] sm:$0xff]   ;;  %v1931_v22 = vld [vmem:[%s2324_s21 + $0x50] sm:$0xff]  }
  0x82   : > { %v1924_v17 = vld [vmem:[%s2331_s24 + $0x40] sm:$0xff]   ;;  %v1928_v19 = vld [vmem:[%s2324_s21 + $0x8] sm:$0xff]   ;;  %v1932_v23 = vld [vmem:[%s2324_s21 + $0x18] sm:$0xff]  }
  0x83   : > { %v1925_v18 = vld [vmem:[%s2331_s24] sm:$0xff]   ;;  %v1929_v20 = vld [vmem:[%s2324_s21 + $0x48] sm:$0xff]   ;;  %v1933_v24 = vld [vmem:[%s2324_s21 + $0x58] sm:$0xff]  }
  0x84   : > { %v1934_v25 = vld [vmem:[%s2324_s21 + $0x20] sm:$0xff]   ;;  %v1936_v27 = vld [vmem:[%s2324_s21 + $0x28] sm:$0xff]   ;;  %v1938_v29 = vld [vmem:[%s2324_s21 + $0x30] sm:$0xff]  }
  0x85   : > { %v1935_v26 = vld [vmem:[%s2324_s21 + $0x60] sm:$0xff]   ;;  %v1937_v28 = vld [vmem:[%s2324_s21 + $0x68] sm:$0xff]   ;;  %v1939_v30 = vld [vmem:[%s2324_s21 + $0x70] sm:$0xff]  }
  0x86   : > { %1737 = vmatpush3.bf16.xpose.msra.mxu0 %v1913_v4  ;;  %1791 = vmatpush3.bf16.xpose.msra.mxu1 %v1913_v4  ;;  %v1940_v31 = vld [vmem:[%s2324_s21 + $0x38] sm:$0xff]  }
  0x87   : > { %1738 = vmatprep.subr.bf16.mxu0 %v1914_v5  ;;  %1784 = vmatprep.subr.bf16.mxu1 %v1914_v5  ;;  %v1941_v32 = vld [vmem:[%s2324_s21 + $0x78] sm:$0xff]  }
  0x8e   : > { %1739 = vmatpush3.bf16.xpose.msra.mxu0 %v1915_v6  ;;  %1792 = vmatpush3.bf16.xpose.msra.mxu1 %v1915_v6 }
  0x8f   : > { %1740 = vmatprep.subr.bf16.mxu0 %v1916_v7  ;;  %1785 = vmatprep.subr.bf16.mxu1 %v1916_v7 }
  0x96   : > { %1741 = vmatpush3.bf16.xpose.msra.mxu0 %v1917_v10  ;;  %1793 = vmatpush3.bf16.xpose.msra.mxu1 %v1917_v10 }
  0x97   : > { %1742 = vmatprep.subr.bf16.mxu0 %v1918_v11  ;;  %1786 = vmatprep.subr.bf16.mxu1 %v1918_v11 }
  0x9e   : > { %1743 = vmatpush3.bf16.xpose.msra.mxu0 %v1919_v12  ;;  %1794 = vmatpush3.bf16.xpose.msra.mxu1 %v1919_v12 }
  0x9f   : > { %1744 = vmatprep.subr.bf16.mxu0 %v1920_v13  ;;  %1787 = vmatprep.subr.bf16.mxu1 %v1920_v13 }
  0xa6   : > { %1745 = vmatpush3.bf16.xpose.msra.mxu0 %v1921_v14  ;;  %1795 = vmatpush3.bf16.xpose.msra.mxu1 %v1921_v14 }
  0xa7   : > { %1746 = vmatprep.subr.bf16.mxu0 %v1922_v15  ;;  %1788 = vmatprep.subr.bf16.mxu1 %v1922_v15 }
  0xae   : > { %1747 = vmatpush3.bf16.xpose.msra.mxu0 %v1923_v16  ;;  %1796 = vmatpush3.bf16.xpose.msra.mxu1 %v1923_v16 }
  0xaf   : > { %1748 = vmatprep.subr.bf16.mxu0 %v1924_v17  ;;  %1789 = vmatprep.subr.bf16.mxu1 %v1924_v17 }
  0xb6   : > { %1749 = vmatpush3.bf16.xpose.msra.mxu0 %v1925_v18  ;;  %1797 = vmatpush3.bf16.xpose.msra.mxu1 %v1925_v18 }
  0xbd   : > { %1751 = vmatmul.mubr.bf16.vlgmr.msra.gmra.mxu0 %v1926_v8  ;;  %1767 = vmatmul.mubr.bf16.vlgmr.msra.gmra.mxu1 %v1927_v9 }
  0xbe   : > { %1752 = vmatprep.mubr.bf16.mxu0 %v1928_v19  ;;  %1768 = vmatprep.mubr.bf16.mxu1 %v1929_v20 }
  0xc5   : > { %1753 = vmatmul.mubr.bf16.gmra.mxu0 %v1928_v19  ;;  %1769 = vmatmul.mubr.bf16.gmra.mxu1 %v1929_v20 }
  0xc6   : > { %1754 = vmatprep.mubr.bf16.mxu0 %v1930_v21  ;;  %1770 = vmatprep.mubr.bf16.mxu1 %v1931_v22 }
  0xcd   : > { %1755 = vmatmul.mubr.bf16.gmra.mxu0 %v1930_v21  ;;  %1771 = vmatmul.mubr.bf16.gmra.mxu1 %v1931_v22 }
  0xce   : > { %1756 = vmatprep.mubr.bf16.mxu0 %v1932_v23  ;;  %1772 = vmatprep.mubr.bf16.mxu1 %v1933_v24 }
  0xd5   : > { %1757 = vmatmul.mubr.bf16.gmra.mxu0 %v1932_v23  ;;  %1773 = vmatmul.mubr.bf16.gmra.mxu1 %v1933_v24 }
  0xd6   : > { %1758 = vmatprep.mubr.bf16.mxu0 %v1934_v25  ;;  %1774 = vmatprep.mubr.bf16.mxu1 %v1935_v26 }
  0xdd   : > { %1759 = vmatmul.mubr.bf16.gmra.mxu0 %v1934_v25  ;;  %1775 = vmatmul.mubr.bf16.gmra.mxu1 %v1935_v26 }
  0xde   : > { %1760 = vmatprep.mubr.bf16.mxu0 %v1936_v27  ;;  %1776 = vmatprep.mubr.bf16.mxu1 %v1937_v28 }
  0xe5   : > { %1761 = vmatmul.mubr.bf16.gmra.mxu0 %v1936_v27  ;;  %1777 = vmatmul.mubr.bf16.gmra.mxu1 %v1937_v28 }
  0xe6   : > { %1762 = vmatprep.mubr.bf16.mxu0 %v1938_v29  ;;  %1778 = vmatprep.mubr.bf16.mxu1 %v1939_v30 }
  0xed   : > { %1763 = vmatmul.mubr.bf16.gmra.mxu0 %v1938_v29  ;;  %1779 = vmatmul.mubr.bf16.gmra.mxu1 %v1939_v30 }
  0xee   : > { %1764 = vmatprep.mubr.bf16.mxu0 %v1940_v31  ;;  %1780 = vmatprep.mubr.bf16.mxu1 %v1941_v32 }
  0xf5   : > { %1765 = vmatmul.mubr.bf16.gmra.mxu0 %v1940_v31  ;;  %1781 = vmatmul.mubr.bf16.gmra.mxu1 %v1941_v32 }
 0x17d   : > { %v2437_v33 = vpop.f32.mrf.mxu0  ;;  %v2439_v34 = vpop.f32.mrf.mxu1 }
 0x17e   : > { %2867 = vst [vmem:[#allocation15_spill] sm:$0xff] %v2437_v33 }
 0x17f   : > { %v2441_v35 = vpop.f32.mrf.mxu0  ;;  %v2443_v36 = vpop.f32.mrf.mxu1 }
 0x180   : > { %2868 = vst [vmem:[#allocation16_spill] sm:$0xff] %v2441_v35 }
 0x181   : > { %v2445_v37 = vpop.f32.mrf.mxu0  ;;  %v2447_v38 = vpop.f32.mrf.mxu1 }
 0x182   : > { %2869 = vst [vmem:[#allocation17_spill] sm:$0xff] %v2445_v37 }
 0x183   : > { %v2449_v39 = vpop.f32.mrf.mxu0  ;;  %v2451_v40 = vpop.f32.mrf.mxu1 }
 0x184   : > { %2870 = vst [vmem:[#allocation18_spill] sm:$0xff] %v2449_v39 }
 0x185   : > { %v2453_v41 = vpop.f32.mrf.mxu0  ;;  %v2455_v42 = vpop.f32.mrf.mxu1 }
 0x187   : > { %v2457_v43 = vpop.f32.mrf.mxu0  ;;  %v2459_v44 = vpop.f32.mrf.mxu1 }
 0x189   : > { %v2461_v45 = vpop.f32.mrf.mxu0  ;;  %v2463_v46 = vpop.f32.mrf.mxu1 }
 0x18a   : > { %2871 = vst [vmem:[#allocation19_spill] sm:$0xff] %v2461_v45 }
 0x18b   : > { %v2465_v47 = vpop.f32.mrf.mxu0  ;;  %v2467_v48 = vpop.f32.mrf.mxu1 }
 0x18c   : > { %2872 = vst [vmem:[#allocation20_spill] sm:$0xff] %v2465_v47 }
 0x18d   : > { %v2469_v49 = vpop.f32.mrf.mxu0  ;;  %v2471_v50 = vpop.f32.mrf.mxu1 }
 0x18f   : > { %v2473_v51 = vpop.f32.mrf.mxu0  ;;  %v2475_v52 = vpop.f32.mrf.mxu1 }
 0x191   : > { %v2477_v53 = vpop.f32.mrf.mxu0  ;;  %v2479_v54 = vpop.f32.mrf.mxu1 }
 0x192   : > { %2873 = vst [vmem:[#allocation21_spill] sm:$0xff] %v2479_v54 }
 0x193   : > { %v2481_v55 = vpop.f32.mrf.mxu0  ;;  %v2483_v56 = vpop.f32.mrf.mxu1 }
 0x194   : > { %2874 = vst [vmem:[#allocation22_spill] sm:$0xff] %v2483_v56 }
 0x195   : > { %v2485_v57 = vpop.f32.mrf.mxu0  ;;  %v2487_v58 = vpop.f32.mrf.mxu1 }
 0x196   : > { %2875 = vst [vmem:[#allocation23_spill] sm:$0xff] %v2487_v58 }
 0x197   : > { %v2489_v59 = vpop.f32.mrf.mxu0  ;;  %v2491_v60 = vpop.f32.mrf.mxu1 }
 0x198   : > { %2876 = vst [vmem:[#allocation24_spill] sm:$0xff] %v2491_v60 }
 0x199   : > { %v2493_v61 = vpop.f32.mrf.mxu0  ;;  %v2495_v62 = vpop.f32.mrf.mxu1 }
 0x19a   : > { %2877 = vst [vmem:[#allocation25_spill] sm:$0xff] %v2495_v62 }
 0x19b   : > { %v2497_v63 = vpop.f32.mrf.mxu0  ;;  %v2499_v0 = vpop.f32.mrf.mxu1 }
 0x19c   : > { %2878 = vst [vmem:[#allocation26_spill] sm:$0xff] %v2499_v0 }
 0x19d   : > { %v2501_v1 = vpop.f32.mrf.mxu0  ;;  %v2503_v2 = vpop.f32.mrf.mxu1 }
 0x19e   : > { %2879 = vst [vmem:[#allocation27_spill] sm:$0xff] %v2503_v2 }
 0x19f   : > { %v2505_v3 = vpop.f32.mrf.mxu0  ;;  %v2507_v4 = vpop.f32.mrf.mxu1 }
 0x1a0   : > { %2880 = vst [vmem:[#allocation28_spill] sm:$0xff] %v2507_v4 }
 0x1a1   : > { %v2509_v5 = vpop.f32.mrf.mxu0  ;;  %v2511_v6 = vpop.f32.mrf.mxu1 }
 0x1a2   : > { %2881 = vst [vmem:[#allocation29_spill] sm:$0xff] %v2511_v6 }
 0x1a3   : > { %v2513_v7 = vpop.f32.mrf.mxu0  ;;  %v2515_v8 = vpop.f32.mrf.mxu1 }
 0x1a4   : > { %2882 = vst [vmem:[#allocation30_spill] sm:$0xff] %v2515_v8 }
 0x1a5   : > { %v2517_v9 = vpop.f32.mrf.mxu0  ;;  %v2519_v10 = vpop.f32.mrf.mxu1 }
 0x1a6   : > { %2883 = vst [vmem:[#allocation31_spill] sm:$0xff] %v2519_v10 }
 0x1a7   : > { %v2521_v11 = vpop.f32.mrf.mxu0  ;;  %v2523_v12 = vpop.f32.mrf.mxu1 }
 0x1a8   : > { %2884 = vst [vmem:[#allocation32_spill] sm:$0xff] %v2523_v12 }
 0x1a9   : > { %v2525_v13 = vpop.f32.mrf.mxu0  ;;  %v2527_v14 = vpop.f32.mrf.mxu1 }
 0x1aa   : > { %2885 = vst [vmem:[#allocation33_spill] sm:$0xff] %v2527_v14 }
 0x1ab   : > { %v2529_v15 = vpop.f32.mrf.mxu0  ;;  %v2531_v16 = vpop.f32.mrf.mxu1 }
 0x1ac   : > { %2886 = vst [vmem:[#allocation34_spill] sm:$0xff] %v2531_v16 }
 0x1ad   : > { %v2533_v17 = vpop.f32.mrf.mxu0  ;;  %v2535_v18 = vpop.f32.mrf.mxu1 }
 0x1ae   : > { %2887 = vst [vmem:[#allocation35_spill] sm:$0xff] %v2535_v18 }
 0x1af   : > { %v2537_v19 = vpop.f32.mrf.mxu0  ;;  %v2539_v20 = vpop.f32.mrf.mxu1 }
 0x1b0   : > { %2888 = vst [vmem:[#allocation36_spill] sm:$0xff] %v2539_v20 }
 0x1b1   : > { %v2541_v21 = vpop.f32.mrf.mxu0  ;;  %v2543_v22 = vpop.f32.mrf.mxu1 }
 0x1b2   : > { %2889 = vst [vmem:[#allocation37_spill] sm:$0xff] %v2543_v22 }
 0x1b3   : > { %v2545_v23 = vpop.f32.mrf.mxu0  ;;  %v2547_v24 = vpop.f32.mrf.mxu1 }
 0x1b4   : > { %2890 = vst [vmem:[#allocation38_spill] sm:$0xff] %v2547_v24 }
 0x1b5   : > { %v2549_v25 = vpop.f32.mrf.mxu0  ;;  %v2551_v26 = vpop.f32.mrf.mxu1 }
 0x1b6   : > { %2891 = vst [vmem:[#allocation39_spill] sm:$0xff] %v2551_v26 }
 0x1b7   : > { %v2553_v27 = vpop.f32.mrf.mxu0  ;;  %v2555_v28 = vpop.f32.mrf.mxu1 }
 0x1b8   : > { %2892 = vst [vmem:[#allocation40_spill] sm:$0xff] %v2555_v28  ;;  %737 = sbr.rel (%p1725_p6) target bundleno = 494 (0x1ee), region = 44 }
 0x1b9   : > { %v2557_v29 = vpop.f32.mrf.mxu0  ;;  %v2559_v30 = vpop.f32.mrf.mxu1 }
 0x1ba   : > { %2893 = vst [vmem:[#allocation41_spill] sm:$0xff] %v2559_v30 }
 0x1bb   : > { %v2561_v31 = vpop.f32.mrf.mxu0  ;;  %v2563_v32 = vpop.f32.mrf.mxu1 }
 0x1bc   : > { %2894 = vst [vmem:[#allocation42_spill] sm:$0xff] %v2563_v32 }
 0x1bd   : > { %v738_v24 = vld [vmem:[#allocation2 + $0xb0] sm:$0xff]  ;;  %v802_v22 = vand.u32 2147483647, %v2437_v33  ;;  %v803_v20 = vand.u32 2147483647, %v2441_v35  ;;  %v740_v18 = vld [vmem:[#allocation2 + $0xd8] sm:$0xff] }
 0x1be   : > { %v739_v26 = vld [vmem:[#allocation2 + $0x1b0] sm:$0xff]  ;;  %v804_v28 = vand.u32 2147483647, %v2445_v37  ;;  %v741_v16 = vld [vmem:[#allocation2 + $0x18] sm:$0xff]  ;;  %v805_v30 = vand.u32 2147483647, %v2449_v39 }
 0x1bf   : > { %v866_v14 = vadd.f32 %v802_v22, %v738_v24  ;;  %v867_v12 = vadd.f32 %v803_v20, %v739_v26  ;;  %v742_v10 = vld [vmem:[#allocation2 + $0x50] sm:$0xff]  ;;  %v806_v32 = vand.u32 2147483647, %v2453_v41  ;;  %v743_v8 = vld [vmem:[#allocation2 + $0x168] sm:$0xff]  ;;  %v807_v6 = vand.u32 2147483647, %v2457_v43 }
 0x1c0   : > { %v868_v4 = vadd.f32 %v804_v28, %v740_v18  ;;  %v869_v2 = vadd.f32 %v805_v30, %v741_v16  ;;  %v744_v33 = vld [vmem:[#allocation2 + $0x130] sm:$0xff]  ;;  %v808_v0 = vand.u32 2147483647, %v2461_v45  ;;  %v745_v35 = vld [vmem:[#allocation2 + $0x48] sm:$0xff]  ;;  %v809_v62 = vand.u32 2147483647, %v2465_v47 }
 0x1c1   : > { %930 = vst [vmem:[#allocation2 + $0xb0] sm:$0xff] %v866_v14  ;;  %931 = vst [vmem:[#allocation2 + $0x1b0] sm:$0xff] %v867_v12  ;;  %v870_v37 = vadd.f32 %v806_v32, %v742_v10  ;;  %v871_v39 = vadd.f32 %v807_v6, %v743_v8  ;;  %v746_v22 = vld [vmem:[#allocation2 + $0x180] sm:$0xff]  ;;  %v810_v20 = vand.u32 2147483647, %v2469_v49  ;;  %v747_v24 = vld [vmem:[#allocation2 + $0x110] sm:$0xff] }
 0x1c2   : > { %v811_v26 = vand.u32 2147483647, %v2473_v51  ;;  %932 = vst [vmem:[#allocation2 + $0xd8] sm:$0xff] %v868_v4  ;;  %933 = vst [vmem:[#allocation2 + $0x18] sm:$0xff] %v869_v2  ;;  %v872_v18 = vadd.f32 %v808_v0, %v744_v33  ;;  %v873_v16 = vadd.f32 %v809_v62, %v745_v35  ;;  %v748_v28 = vld [vmem:[#allocation2 + $0x118] sm:$0xff]  ;;  %v750_v8 = vld [vmem:[#allocation2 + $0x120] sm:$0xff] }
 0x1c3   : > { %v812_v30 = vand.u32 2147483647, %v2477_v53  ;;  %v749_v45 = vld [vmem:[#allocation2 + $0x98] sm:$0xff]  ;;  %v813_v47 = vand.u32 2147483647, %v2481_v55  ;;  %934 = vst [vmem:[#allocation2 + $0x50] sm:$0xff] %v870_v37  ;;  %v874_v10 = vadd.f32 %v810_v20, %v746_v22 }
 0x1c4   : > { %935 = vst [vmem:[#allocation2 + $0x168] sm:$0xff] %v871_v39  ;;  %v875_v6 = vadd.f32 %v811_v26, %v747_v24  ;;  %v814_v12 = vand.u32 2147483647, %v2485_v57  ;;  %v751_v14 = vld [vmem:[#allocation2 + $0x150] sm:$0xff]  ;;  %v815_v32 = vand.u32 2147483647, %v2489_v59 }
 0x1c5   : > { %936 = vst [vmem:[#allocation2 + $0x130] sm:$0xff] %v872_v18  ;;  %937 = vst [vmem:[#allocation2 + $0x48] sm:$0xff] %v873_v16  ;;  %v876_v33 = vadd.f32 %v812_v30, %v748_v28  ;;  %v877_v35 = vadd.f32 %v813_v47, %v749_v45  ;;  %v752_v62 = vld [vmem:[#allocation2 + $0x108] sm:$0xff]  ;;  %v816_v0 = vand.u32 2147483647, %v2493_v61  ;;  %v753_v2 = vld [vmem:[#allocation2 + $0x60] sm:$0xff] }
 0x1c6   : > { %v817_v4 = vand.u32 2147483647, %v2497_v63  ;;  %938 = vst [vmem:[#allocation2 + $0x180] sm:$0xff] %v874_v10  ;;  %939 = vst [vmem:[#allocation2 + $0x110] sm:$0xff] %v875_v6  ;;  %v878_v37 = vadd.f32 %v814_v12, %v750_v8  ;;  %v879_v39 = vadd.f32 %v815_v32, %v751_v14  ;;  %v754_v22 = vld [vmem:[#allocation2 + $0xe0] sm:$0xff]  ;;  %v755_v24 = vld [vmem:[#allocation2 + $0x188] sm:$0xff] }
 0x1c7   : > { %v818_v20 = vand.u32 2147483647, %v2501_v1  ;;  %v819_v26 = vand.u32 2147483647, %v2505_v3  ;;  %940 = vst [vmem:[#allocation2 + $0x118] sm:$0xff] %v876_v33  ;;  %941 = vst [vmem:[#allocation2 + $0x98] sm:$0xff] %v877_v35  ;;  %v880_v18 = vadd.f32 %v816_v0, %v752_v62 }
 0x1c8   : > { %v881_v45 = vadd.f32 %v817_v4, %v753_v2  ;;  %v756_v47 = vld [vmem:[#allocation2 + $0x138] sm:$0xff]  ;;  %v820_v16 = vand.u32 2147483647, %v2509_v5  ;;  %v757_v28 = vld [vmem:[#allocation2 + $0x140] sm:$0xff]  ;;  %v821_v30 = vand.u32 2147483647, %v2513_v7 }
 0x1c9   : > { %942 = vst [vmem:[#allocation2 + $0x120] sm:$0xff] %v878_v37  ;;  %943 = vst [vmem:[#allocation2 + $0x150] sm:$0xff] %v879_v39  ;;  %v882_v10 = vadd.f32 %v818_v20, %v754_v22  ;;  %v883_v6 = vadd.f32 %v819_v26, %v755_v24  ;;  %v758_v8 = vld [vmem:[#allocation2 + $0x80] sm:$0xff]  ;;  %v822_v12 = vand.u32 2147483647, %v2517_v9  ;;  %v759_v14 = vld [vmem:[#allocation2 + $0x1a8] sm:$0xff] }
 0x1ca   : > { %v823_v32 = vand.u32 2147483647, %v2521_v11  ;;  %944 = vst [vmem:[#allocation2 + $0x108] sm:$0xff] %v880_v18  ;;  %945 = vst [vmem:[#allocation2 + $0x60] sm:$0xff] %v881_v45  ;;  %v884_v33 = vadd.f32 %v820_v16, %v756_v47  ;;  %v885_v35 = vadd.f32 %v821_v30, %v757_v28  ;;  %v760_v62 = vld [vmem:[#allocation2 + $0x1b8] sm:$0xff]  ;;  %v761_v2 = vld [vmem:[#allocation2 + $0x28] sm:$0xff] }
 0x1cb   : > { %v824_v0 = vand.u32 2147483647, %v2525_v13  ;;  %v825_v4 = vand.u32 2147483647, %v2529_v15  ;;  %946 = vst [vmem:[#allocation2 + $0xe0] sm:$0xff] %v882_v10  ;;  %947 = vst [vmem:[#allocation2 + $0x188] sm:$0xff] %v883_v6  ;;  %v886_v37 = vadd.f32 %v822_v12, %v758_v8 }
 0x1cc   : > { %v887_v39 = vadd.f32 %v823_v32, %v759_v14  ;;  %v762_v22 = vld [vmem:[#allocation2 + $0x1e8] sm:$0xff]  ;;  %v826_v20 = vand.u32 2147483647, %v2533_v17  ;;  %v763_v24 = vld [vmem:[#allocation2 + $0xf8] sm:$0xff]  ;;  %v827_v26 = vand.u32 2147483647, %v2537_v19 }
 0x1cd   : > { %948 = vst [vmem:[#allocation2 + $0x138] sm:$0xff] %v884_v33  ;;  %949 = vst [vmem:[#allocation2 + $0x140] sm:$0xff] %v885_v35  ;;  %v888_v18 = vadd.f32 %v824_v0, %v760_v62  ;;  %v889_v45 = vadd.f32 %v825_v4, %v761_v2  ;;  %v764_v47 = vld [vmem:[#allocation2 + $0x160] sm:$0xff]  ;;  %v828_v16 = vand.u32 2147483647, %v2541_v21  ;;  %v765_v28 = vld [vmem:[#allocation2 + $0x30] sm:$0xff] }
 0x1ce   : > { %v829_v30 = vand.u32 2147483647, %v2545_v23  ;;  %950 = vst [vmem:[#allocation2 + $0x80] sm:$0xff] %v886_v37  ;;  %951 = vst [vmem:[#allocation2 + $0x1a8] sm:$0xff] %v887_v39  ;;  %v890_v10 = vadd.f32 %v826_v20, %v762_v22  ;;  %v891_v6 = vadd.f32 %v827_v26, %v763_v24  ;;  %v766_v8 = vld [vmem:[#allocation2 + $0x1e0] sm:$0xff]  ;;  %v768_v62 = vld [vmem:[#allocation2 + $0xf0] sm:$0xff] }
 0x1cf   : > { %v830_v12 = vand.u32 2147483647, %v2549_v25  ;;  %v767_v14 = vld [vmem:[#allocation2] sm:$0xff]  ;;  %v831_v32 = vand.u32 2147483647, %v2553_v27  ;;  %952 = vst [vmem:[#allocation2 + $0x1b8] sm:$0xff] %v888_v18  ;;  %v892_v33 = vadd.f32 %v828_v16, %v764_v47 }
 0x1d0   : > { %953 = vst [vmem:[#allocation2 + $0x28] sm:$0xff] %v889_v45  ;;  %v893_v35 = vadd.f32 %v829_v30, %v765_v28  ;;  %v832_v0 = vand.u32 2147483647, %v2557_v29  ;;  %v769_v2 = vld [vmem:[#allocation2 + $0x8] sm:$0xff]  ;;  %v833_v4 = vand.u32 2147483647, %v2561_v31 }
 0x1d1   : > { %954 = vst [vmem:[#allocation2 + $0x1e8] sm:$0xff] %v890_v10  ;;  %955 = vst [vmem:[#allocation2 + $0xf8] sm:$0xff] %v891_v6  ;;  %v894_v37 = vadd.f32 %v830_v12, %v766_v8  ;;  %v895_v39 = vadd.f32 %v831_v32, %v767_v14  ;;  %v770_v22 = vld [vmem:[#allocation2 + $0x148] sm:$0xff]  ;;  %v834_v20 = vand.u32 2147483647, %v2439_v34  ;;  %v771_v24 = vld [vmem:[#allocation2 + $0x1d0] sm:$0xff] }
 0x1d2   : > { %v835_v26 = vand.u32 2147483647, %v2443_v36  ;;  %956 = vst [vmem:[#allocation2 + $0x160] sm:$0xff] %v892_v33  ;;  %957 = vst [vmem:[#allocation2 + $0x30] sm:$0xff] %v893_v35  ;;  %v896_v18 = vadd.f32 %v832_v0, %v768_v62  ;;  %v897_v45 = vadd.f32 %v833_v4, %v769_v2  ;;  %v772_v47 = vld [vmem:[#allocation2 + $0x100] sm:$0xff]  ;;  %v773_v28 = vld [vmem:[#allocation2 + $0xc8] sm:$0xff] }
 0x1d3   : > { %v836_v16 = vand.u32 2147483647, %v2447_v38  ;;  %v837_v30 = vand.u32 2147483647, %v2451_v40  ;;  %958 = vst [vmem:[#allocation2 + $0x1e0] sm:$0xff] %v894_v37  ;;  %959 = vst [vmem:[#allocation2] sm:$0xff] %v895_v39  ;;  %v898_v10 = vadd.f32 %v834_v20, %v770_v22 }
 0x1d4   : > { %v899_v6 = vadd.f32 %v835_v26, %v771_v24  ;;  %v774_v8 = vld [vmem:[#allocation2 + $0x40] sm:$0xff]  ;;  %v838_v12 = vand.u32 2147483647, %v2455_v42  ;;  %v775_v14 = vld [vmem:[#allocation2 + $0x1f8] sm:$0xff]  ;;  %v839_v32 = vand.u32 2147483647, %v2459_v44 }
 0x1d5   : > { %960 = vst [vmem:[#allocation2 + $0xf0] sm:$0xff] %v896_v18  ;;  %961 = vst [vmem:[#allocation2 + $0x8] sm:$0xff] %v897_v45  ;;  %v900_v33 = vadd.f32 %v836_v16, %v772_v47  ;;  %v901_v35 = vadd.f32 %v837_v30, %v773_v28  ;;  %v776_v62 = vld [vmem:[#allocation2 + $0x20] sm:$0xff]  ;;  %v840_v0 = vand.u32 2147483647, %v2463_v46  ;;  %v777_v2 = vld [vmem:[#allocation2 + $0x128] sm:$0xff] }
 0x1d6   : > { %v841_v4 = vand.u32 2147483647, %v2467_v48  ;;  %962 = vst [vmem:[#allocation2 + $0x148] sm:$0xff] %v898_v10  ;;  %963 = vst [vmem:[#allocation2 + $0x1d0] sm:$0xff] %v899_v6  ;;  %v902_v37 = vadd.f32 %v838_v12, %v774_v8  ;;  %v903_v39 = vadd.f32 %v839_v32, %v775_v14  ;;  %v778_v22 = vld [vmem:[#allocation2 + $0x1a0] sm:$0xff]  ;;  %v779_v24 = vld [vmem:[#allocation2 + $0x1f0] sm:$0xff] }
 0x1d7   : > { %v842_v20 = vand.u32 2147483647, %v2471_v50  ;;  %v843_v26 = vand.u32 2147483647, %v2475_v52  ;;  %964 = vst [vmem:[#allocation2 + $0x100] sm:$0xff] %v900_v33  ;;  %965 = vst [vmem:[#allocation2 + $0xc8] sm:$0xff] %v901_v35  ;;  %v904_v18 = vadd.f32 %v840_v0, %v776_v62 }
 0x1d8   : > { %v905_v45 = vadd.f32 %v841_v4, %v777_v2  ;;  %v780_v47 = vld [vmem:[#allocation2 + $0xe8] sm:$0xff]  ;;  %v844_v16 = vand.u32 2147483647, %v2479_v54  ;;  %v781_v28 = vld [vmem:[#allocation2 + $0x78] sm:$0xff]  ;;  %v845_v30 = vand.u32 2147483647, %v2483_v56 }
 0x1d9   : > { %966 = vst [vmem:[#allocation2 + $0x40] sm:$0xff] %v902_v37  ;;  %967 = vst [vmem:[#allocation2 + $0x1f8] sm:$0xff] %v903_v39  ;;  %v906_v10 = vadd.f32 %v842_v20, %v778_v22  ;;  %v907_v6 = vadd.f32 %v843_v26, %v779_v24  ;;  %v782_v8 = vld [vmem:[#allocation2 + $0x70] sm:$0xff]  ;;  %v846_v12 = vand.u32 2147483647, %v2487_v58  ;;  %v784_v62 = vld [vmem:[#allocation2 + $0x1d8] sm:$0xff] }
 0x1da   : > { %v783_v14 = vld [vmem:[#allocation2 + $0x90] sm:$0xff]  ;;  %v847_v32 = vand.u32 2147483647, %v2491_v60  ;;  %968 = vst [vmem:[#allocation2 + $0x20] sm:$0xff] %v904_v18  ;;  %969 = vst [vmem:[#allocation2 + $0x128] sm:$0xff] %v905_v45  ;;  %v908_v33 = vadd.f32 %v844_v16, %v780_v47  ;;  %v909_v35 = vadd.f32 %v845_v30, %v781_v28  ;;  %v2895_v0 = vld [vmem:[#allocation25_spill] sm:$0xff] }
 0x1db   : > { %v848_v2 = vand.u32 2147483647, %v2895_v0  ;;  %v785_v4 = vld [vmem:[#allocation2 + $0xd0] sm:$0xff]  ;;  %v2896_v54 = vld [vmem:[#allocation26_spill] sm:$0xff]  ;;  %970 = vst [vmem:[#allocation2 + $0x1a0] sm:$0xff] %v906_v10  ;;  %971 = vst [vmem:[#allocation2 + $0x1f0] sm:$0xff] %v907_v6  ;;  %v910_v37 = vadd.f32 %v846_v12, %v782_v8 }
 0x1dc   : > { %v849_v56 = vand.u32 2147483647, %v2896_v54  ;;  %v911_v39 = vadd.f32 %v847_v32, %v783_v14  ;;  %v786_v22 = vld [vmem:[#allocation2 + $0xb8] sm:$0xff]  ;;  %v2897_v20 = vld [vmem:[#allocation27_spill] sm:$0xff]  ;;  %v787_v26 = vld [vmem:[#allocation2 + $0x88] sm:$0xff]  ;;  %972 = vst [vmem:[#allocation2 + $0xe8] sm:$0xff] %v908_v33 }
 0x1dd   : > { %v850_v24 = vand.u32 2147483647, %v2897_v20  ;;  %v2898_v58 = vld [vmem:[#allocation28_spill] sm:$0xff]  ;;  %973 = vst [vmem:[#allocation2 + $0x78] sm:$0xff] %v909_v35  ;;  %v912_v18 = vadd.f32 %v848_v2, %v784_v62  ;;  %v788_v47 = vld [vmem:[#allocation2 + $0xa8] sm:$0xff]  ;;  %v2899_v16 = vld [vmem:[#allocation29_spill] sm:$0xff] }
 0x1de   : > { %v851_v60 = vand.u32 2147483647, %v2898_v58  ;;  %v913_v45 = vadd.f32 %v849_v56, %v785_v4  ;;  %v852_v28 = vand.u32 2147483647, %v2899_v16  ;;  %v789_v30 = vld [vmem:[#allocation2 + $0x1c8] sm:$0xff]  ;;  %974 = vst [vmem:[#allocation2 + $0x70] sm:$0xff] %v910_v37 }
 0x1df   : > { %v2900_v0 = vld [vmem:[#allocation30_spill] sm:$0xff]  ;;  %975 = vst [vmem:[#allocation2 + $0x90] sm:$0xff] %v911_v39  ;;  %v914_v10 = vadd.f32 %v850_v24, %v786_v22  ;;  %v790_v8 = vld [vmem:[#allocation2 + $0x170] sm:$0xff]  ;;  %v791_v32 = vld [vmem:[#allocation2 + $0x178] sm:$0xff] }
 0x1e0   : > { %v853_v54 = vand.u32 2147483647, %v2900_v0  ;;  %v915_v6 = vadd.f32 %v851_v60, %v787_v26  ;;  %v2901_v12 = vld [vmem:[#allocation31_spill] sm:$0xff]  ;;  %v2902_v20 = vld [vmem:[#allocation32_spill] sm:$0xff]  ;;  %976 = vst [vmem:[#allocation2 + $0x1d8] sm:$0xff] %v912_v18  ;;  %977 = vst [vmem:[#allocation2 + $0xd0] sm:$0xff] %v913_v45  ;;  %v916_v33 = vadd.f32 %v852_v28, %v788_v47 }
 0x1e1   : > { %v854_v14 = vand.u32 2147483647, %v2901_v12  ;;  %v855_v58 = vand.u32 2147483647, %v2902_v20  ;;  %v792_v35 = vld [vmem:[#allocation2 + $0x68] sm:$0xff]  ;;  %v2903_v62 = vld [vmem:[#allocation33_spill] sm:$0xff] }
 0x1e2   : > { %v917_v56 = vadd.f32 %v853_v54, %v789_v30  ;;  %v856_v2 = vand.u32 2147483647, %v2903_v62  ;;  %v793_v4 = vld [vmem:[#allocation2 + $0x190] sm:$0xff]  ;;  %v2904_v16 = vld [vmem:[#allocation34_spill] sm:$0xff]  ;;  %978 = vst [vmem:[#allocation2 + $0xb8] sm:$0xff] %v914_v10  ;;  %979 = vst [vmem:[#allocation2 + $0x88] sm:$0xff] %v915_v6 }
 0x1e3   : > { %v857_v0 = vand.u32 2147483647, %v2904_v16  ;;  %v918_v37 = vadd.f32 %v854_v14, %v790_v8  ;;  %v919_v60 = vadd.f32 %v855_v58, %v791_v32  ;;  %v794_v39 = vld [vmem:[#allocation2 + $0x198] sm:$0xff]  ;;  %v2905_v22 = vld [vmem:[#allocation35_spill] sm:$0xff]  ;;  %980 = vst [vmem:[#allocation2 + $0xa8] sm:$0xff] %v916_v33  ;;  %v796_v47 = vld [vmem:[#allocation2 + $0xc0] sm:$0xff] }
 0x1e4   : > { %v858_v24 = vand.u32 2147483647, %v2905_v22  ;;  %v795_v26 = vld [vmem:[#allocation2 + $0x38] sm:$0xff]  ;;  %981 = vst [vmem:[#allocation2 + $0x1c8] sm:$0xff] %v917_v56  ;;  %v920_v18 = vadd.f32 %v856_v2, %v792_v35  ;;  %v2907_v28 = vld [vmem:[#allocation37_spill] sm:$0xff]  ;;  %v2908_v62 = vld [vmem:[#allocation38_spill] sm:$0xff] }
 0x1e5   : > { %v2906_v12 = vld [vmem:[#allocation36_spill] sm:$0xff]  ;;  %v921_v45 = vadd.f32 %v857_v0, %v793_v4  ;;  %v860_v30 = vand.u32 2147483647, %v2907_v28  ;;  %v797_v54 = vld [vmem:[#allocation2 + $0x1c0] sm:$0xff]  ;;  %v861_v16 = vand.u32 2147483647, %v2908_v62 }
 0x1e6   : > { %v859_v20 = vand.u32 2147483647, %v2906_v12  ;;  %982 = vst [vmem:[#allocation2 + $0x170] sm:$0xff] %v918_v37  ;;  %983 = vst [vmem:[#allocation2 + $0x178] sm:$0xff] %v919_v60  ;;  %v922_v10 = vadd.f32 %v858_v24, %v794_v39  ;;  %v798_v8 = vld [vmem:[#allocation2 + $0x158] sm:$0xff]  ;;  %v2909_v14 = vld [vmem:[#allocation39_spill] sm:$0xff] }
 0x1e7   : > { %v862_v32 = vand.u32 2147483647, %v2909_v14  ;;  %v799_v58 = vld [vmem:[#allocation2 + $0x10] sm:$0xff]  ;;  %v2910_v22 = vld [vmem:[#allocation40_spill] sm:$0xff]  ;;  %984 = vst [vmem:[#allocation2 + $0x68] sm:$0xff] %v920_v18  ;;  %985 = vst [vmem:[#allocation2 + $0x190] sm:$0xff] %v921_v45  ;;  %v924_v33 = vadd.f32 %v860_v30, %v796_v47  ;;  %v925_v56 = vadd.f32 %v861_v16, %v797_v54 }
 0x1e8   : > { %v923_v6 = vadd.f32 %v859_v20, %v795_v26  ;;  %v863_v12 = vand.u32 2147483647, %v2910_v22  ;;  %v800_v35 = vld [vmem:[#allocation2 + $0x58] sm:$0xff]  ;;  %v2911_v2 = vld [vmem:[#allocation41_spill] sm:$0xff]  ;;  %v2912_v28 = vld [vmem:[#allocation42_spill] sm:$0xff]  ;;  %986 = vst [vmem:[#allocation2 + $0x198] sm:$0xff] %v922_v10 }
 0x1e9   : > { %v864_v4 = vand.u32 2147483647, %v2911_v2  ;;  %v801_v0 = vld [vmem:[#allocation2 + $0xa0] sm:$0xff]  ;;  %v865_v62 = vand.u32 2147483647, %v2912_v28  ;;  %v926_v37 = vadd.f32 %v862_v32, %v798_v8  ;;  %988 = vst [vmem:[#allocation2 + $0xc0] sm:$0xff] %v924_v33 }
 0x1ea   : > { %987 = vst [vmem:[#allocation2 + $0x38] sm:$0xff] %v923_v6  ;;  %v927_v60 = vadd.f32 %v863_v12, %v799_v58  ;;  %989 = vst [vmem:[#allocation2 + $0x1c0] sm:$0xff] %v925_v56 }
 0x1eb   : > { %v928_v39 = vadd.f32 %v864_v4, %v800_v35  ;;  %v929_v24 = vadd.f32 %v865_v62, %v801_v0  ;;  %990 = vst [vmem:[#allocation2 + $0x158] sm:$0xff] %v926_v37 }
 0x1ec   : > { %991 = vst [vmem:[#allocation2 + $0x10] sm:$0xff] %v927_v60 }
 0x1ed   : > { %992 = vst [vmem:[#allocation2 + $0x58] sm:$0xff] %v928_v39  ;;  %993 = vst [vmem:[#allocation2 + $0xa0] sm:$0xff] %v929_v24 }
 0x1ee PF: > { %p1726_p9 = scmp.ne.s32.totalorder %s2110_s16, %s2106_s15 }
 0x1f0   : > { %997 = sbr.rel (%p1726_p9) target bundleno = 567 (0x237), region = 48 }
 0x1f5   : > { %v998_v26 = vlaneseq  ;;  %v1035_v20 = vld [vmem:[#allocation2 + $0x1b0] sm:$0xff]  ;;  %v2913_v18 = vld [vmem:[#allocation16_spill] sm:$0xff]  ;;  %v2915_v16 = vld [vmem:[#allocation18_spill] sm:$0xff]  ;;  %v1166_v56 = vand.u32 2147483647, %v2453_v41 }
 0x1f6   : > { %v1163_v45 = vand.u32 2147483647, %v2913_v18  ;;  %v2914_v47 = vld [vmem:[#allocation15_spill] sm:$0xff]  ;;  %v1037_v54 = vld [vmem:[#allocation2 + $0x18] sm:$0xff]  ;;  %v1165_v10 = vand.u32 2147483647, %v2915_v16 }
 0x1f7   : > { %v1162_v30 = vand.u32 2147483647, %v2914_v47  ;;  %v2636_v6 = vshrl.u32 %v998_v26, 7  ;;  %v2638_v8 = vand.u32 127, %v998_v26  ;;  %v1034_v14 = vld [vmem:[#allocation2 + $0xb0] sm:$0xff]  ;;  %v2916_v58 = vld [vmem:[#allocation17_spill] sm:$0xff] }
 0x1f8   : > { %v1291_v32 = vadd.f32 %v1163_v45, %v1035_v20  ;;  %v1164_v22 = vand.u32 2147483647, %v2916_v58  ;;  %v1039_v12 = vld [vmem:[#allocation2 + $0x168] sm:$0xff]  ;;  %v1293_v33 = vadd.f32 %v1165_v10, %v1037_v54  ;;  %v1167_v35 = vand.u32 2147483647, %v2457_v43  ;;  %v2917_v2 = vld [vmem:[#allocation19_spill] sm:$0xff] }
 0x1f9   : > { %v1168_v4 = vand.u32 2147483647, %v2917_v2  ;;  %vm1098_vm0 = vcmp.eq.s32.totalorder %v2636_v6, %v2638_v8  ;;  %v1000_v0 = vadd.s32 8, %v2636_v6  ;;  %v1036_v28 = vld [vmem:[#allocation2 + $0xd8] sm:$0xff]  ;;  %v1001_v62 = vadd.s32 16, %v2636_v6  ;;  %v1041_v60 = vld [vmem:[#allocation2 + $0x48] sm:$0xff] }
 0x1fa   : > { %1355 = vst [vmem:[#allocation2 + $0x1b0] sm:$0xff] %v1291_v32  ;;  %v1002_v37 = vadd.s32 24, %v2636_v6  ;;  %v1226_v39 = vsel %vm1098_vm0, 0.0, %v1162_v30  ;;  %1357 = vst [vmem:[#allocation2 + $0x18] sm:$0xff] %v1293_v33  ;;  %v1038_v24 = vld [vmem:[#allocation2 + $0x50] sm:$0xff]  ;;  %v1295_v41 = vadd.f32 %v1167_v35, %v1039_v12  ;;  %v2918_v43 = vld [vmem:[#allocation20_spill] sm:$0xff] }
 0x1fb   : > { %v1040_v26 = vld [vmem:[#allocation2 + $0x130] sm:$0xff]  ;;  %v1169_v20 = vand.u32 2147483647, %v2918_v43  ;;  %v1003_v18 = vadd.s32 32, %v2636_v6  ;;  %v1290_v45 = vadd.f32 %v1226_v39, %v1034_v14  ;;  %vm1100_vm1 = vcmp.eq.s32.totalorder %v1000_v0, %v2638_v8  ;;  %v1042_v10 = vld [vmem:[#allocation2 + $0x180] sm:$0xff]  ;;  %v1044_v14 = vld [vmem:[#allocation2 + $0x118] sm:$0xff] }
 0x1fc   : > { %vm1102_vm2 = vcmp.eq.s32.totalorder %v1001_v62, %v2638_v8  ;;  %vm1104_vm3 = vcmp.eq.s32.totalorder %v1002_v37, %v2638_v8  ;;  %v1228_v47 = vsel %vm1100_vm1, 0.0, %v1164_v22  ;;  %1359 = vst [vmem:[#allocation2 + $0x168] sm:$0xff] %v1295_v41  ;;  %v1043_v32 = vld [vmem:[#allocation2 + $0x110] sm:$0xff]  ;;  %v1045_v35 = vld [vmem:[#allocation2 + $0x98] sm:$0xff]  ;;  %v1046_v2 = vld [vmem:[#allocation2 + $0x120] sm:$0xff] }
 0x1fd   : > { %v1230_v54 = vsel %vm1102_vm2, 0.0, %v1166_v56  ;;  %v1232_v16 = vsel %vm1104_vm3, 0.0, %v1168_v4  ;;  %v1297_v30 = vadd.f32 %v1169_v20, %v1041_v60  ;;  %1354 = vst [vmem:[#allocation2 + $0xb0] sm:$0xff] %v1290_v45  ;;  %v1292_v58 = vadd.f32 %v1228_v47, %v1036_v28  ;;  %v1051_v45 = vld [vmem:[#allocation2 + $0x188] sm:$0xff] }
 0x1fe   : > { %v1294_v12 = vadd.f32 %v1230_v54, %v1038_v24  ;;  %v1296_v33 = vadd.f32 %v1232_v16, %v1040_v26  ;;  %vm1106_vm4 = vcmp.eq.s32.totalorder %v1003_v18, %v2638_v8  ;;  %v1170_v0 = vand.u32 2147483647, %v2469_v49  ;;  %v1047_v26 = vld [vmem:[#allocation2 + $0x150] sm:$0xff]  ;;  %v1048_v18 = vld [vmem:[#allocation2 + $0x108] sm:$0xff] }
 0x1ff   : > { %1361 = vst [vmem:[#allocation2 + $0x48] sm:$0xff] %v1297_v30  ;;  %v1171_v22 = vand.u32 2147483647, %v2473_v51  ;;  %v1004_v56 = vadd.s32 40, %v2636_v6  ;;  %v1005_v4 = vadd.s32 48, %v2636_v6  ;;  %1356 = vst [vmem:[#allocation2 + $0xd8] sm:$0xff] %v1292_v58 }
 0x200   : > { %1358 = vst [vmem:[#allocation2 + $0x50] sm:$0xff] %v1294_v12  ;;  %1360 = vst [vmem:[#allocation2 + $0x130] sm:$0xff] %v1296_v33  ;;  %v1172_v28 = vand.u32 2147483647, %v2477_v53  ;;  %v1173_v62 = vand.u32 2147483647, %v2481_v55 }
 0x201   : > { %v1174_v37 = vand.u32 2147483647, %v2485_v57  ;;  %v1234_v60 = vsel %vm1106_vm4, 0.0, %v1170_v0  ;;  %v1299_v39 = vadd.f32 %v1171_v22, %v1043_v32  ;;  %vm1108_vm5 = vcmp.eq.s32.totalorder %v1004_v56, %v2638_v8  ;;  %v1049_v57 = vld [vmem:[#allocation2 + $0x60] sm:$0xff]  ;;  %v1055_v56 = vld [vmem:[#allocation2 + $0x1a8] sm:$0xff] }
 0x202   : > { %vm1110_vm6 = vcmp.eq.s32.totalorder %v1005_v4, %v2638_v8  ;;  %v1298_v49 = vadd.f32 %v1234_v60, %v1042_v10  ;;  %v1236_v51 = vsel %vm1108_vm5, 0.0, %v1172_v28  ;;  %v1301_v24 = vadd.f32 %v1173_v62, %v1045_v35  ;;  %v1053_v0 = vld [vmem:[#allocation2 + $0x140] sm:$0xff]  ;;  %v1057_v62 = vld [vmem:[#allocation2 + $0x28] sm:$0xff] }
 0x203   : > { %v1238_v41 = vsel %vm1110_vm6, 0.0, %v1174_v37  ;;  %1363 = vst [vmem:[#allocation2 + $0x110] sm:$0xff] %v1299_v39  ;;  %v1300_v43 = vadd.f32 %v1236_v51, %v1044_v14  ;;  %v1175_v53 = vand.u32 2147483647, %v2489_v59  ;;  %v1006_v55 = vadd.s32 56, %v2636_v6  ;;  %v1050_v59 = vld [vmem:[#allocation2 + $0xe0] sm:$0xff] }
 0x204   : > { %v1302_v20 = vadd.f32 %v1238_v41, %v1046_v2  ;;  %1362 = vst [vmem:[#allocation2 + $0x180] sm:$0xff] %v1298_v49  ;;  %1365 = vst [vmem:[#allocation2 + $0x98] sm:$0xff] %v1301_v24  ;;  %v1176_v47 = vand.u32 2147483647, %v2493_v61  ;;  %v1177_v54 = vand.u32 2147483647, %v2497_v63 }
 0x205   : > { %v1007_v16 = vadd.s32 64, %v2636_v6  ;;  %v1008_v30 = vadd.s32 72, %v2636_v6  ;;  %1364 = vst [vmem:[#allocation2 + $0x118] sm:$0xff] %v1300_v43  ;;  %v1303_v10 = vadd.f32 %v1175_v53, %v1047_v26  ;;  %vm1112_vm7 = vcmp.eq.s32.totalorder %v1006_v55, %v2638_v8  ;;  %v1052_v61 = vld [vmem:[#allocation2 + $0x138] sm:$0xff]  ;;  %v1054_v22 = vld [vmem:[#allocation2 + $0x80] sm:$0xff] }
 0x206   : > { %1366 = vst [vmem:[#allocation2 + $0x120] sm:$0xff] %v1302_v20  ;;  %v1178_v32 = vand.u32 2147483647, %v2501_v1  ;;  %v1179_v58 = vand.u32 2147483647, %v2505_v3  ;;  %v1240_v12 = vsel %vm1112_vm7, 0.0, %v1176_v47  ;;  %v1305_v33 = vadd.f32 %v1177_v54, %v1049_v57 }
 0x207   : > { %vm1114_vm8 = vcmp.eq.s32.totalorder %v1007_v16, %v2638_v8  ;;  %vm1116_vm9 = vcmp.eq.s32.totalorder %v1008_v30, %v2638_v8  ;;  %1367 = vst [vmem:[#allocation2 + $0x150] sm:$0xff] %v1303_v10  ;;  %v1304_v63 = vadd.f32 %v1240_v12, %v1048_v18  ;;  %v1180_v2 = vand.u32 2147483647, %v2509_v5  ;;  %v1059_v55 = vld [vmem:[#allocation2 + $0xf8] sm:$0xff]  ;;  %v1061_v47 = vld [vmem:[#allocation2 + $0x30] sm:$0xff] }
 0x208   : > { %v1242_v14 = vsel %vm1114_vm8, 0.0, %v1178_v32  ;;  %v1307_v35 = vadd.f32 %v1179_v58, %v1051_v45  ;;  %1369 = vst [vmem:[#allocation2 + $0x60] sm:$0xff] %v1305_v33  ;;  %v1181_v3 = vand.u32 2147483647, %v2513_v7  ;;  %v1009_v4 = vadd.s32 80, %v2636_v6  ;;  %v1056_v7 = vld [vmem:[#allocation2 + $0x1b8] sm:$0xff] }
 0x209   : > { %v1306_v1 = vadd.f32 %v1242_v14, %v1050_v59  ;;  %v1182_v28 = vand.u32 2147483647, %v2517_v9  ;;  %1368 = vst [vmem:[#allocation2 + $0x108] sm:$0xff] %v1304_v63  ;;  %v1244_v37 = vsel %vm1116_vm9, 0.0, %v1180_v2  ;;  %v1183_v60 = vand.u32 2147483647, %v2521_v11 }
 0x20a   : > { %1371 = vst [vmem:[#allocation2 + $0x188] sm:$0xff] %v1307_v35  ;;  %v1010_v5 = vadd.s32 88, %v2636_v6  ;;  %v1184_v39 = vand.u32 2147483647, %v2525_v13  ;;  %v1308_v49 = vadd.f32 %v1244_v37, %v1052_v61  ;;  %v1309_v51 = vadd.f32 %v1181_v3, %v1053_v0  ;;  %v1058_v13 = vld [vmem:[#allocation2 + $0x1e8] sm:$0xff]  ;;  %v1060_v45 = vld [vmem:[#allocation2 + $0x160] sm:$0xff] }
 0x20b   : > { %1370 = vst [vmem:[#allocation2 + $0xe0] sm:$0xff] %v1306_v1  ;;  %vm1118_vm10 = vcmp.eq.s32.totalorder %v1009_v4, %v2638_v8  ;;  %v1185_v9 = vand.u32 2147483647, %v2529_v15  ;;  %v1311_v41 = vadd.f32 %v1183_v60, %v1055_v56  ;;  %v1011_v26 = vadd.s32 96, %v2636_v6  ;;  %v1062_v32 = vld [vmem:[#allocation2 + $0x1e0] sm:$0xff]  ;;  %v1065_v35 = vld [vmem:[#allocation2 + $0x8] sm:$0xff] }
 0x20c   : > { %v1246_v24 = vsel %vm1118_vm10, 0.0, %v1182_v28  ;;  %vm1120_vm11 = vcmp.eq.s32.totalorder %v1010_v5, %v2638_v8  ;;  %1372 = vst [vmem:[#allocation2 + $0x138] sm:$0xff] %v1308_v49  ;;  %1373 = vst [vmem:[#allocation2 + $0x140] sm:$0xff] %v1309_v51  ;;  %v1186_v53 = vand.u32 2147483647, %v2533_v17  ;;  %v1012_v57 = vadd.s32 104, %v2636_v6 }
 0x20d   : > { %v1310_v11 = vadd.f32 %v1246_v24, %v1054_v22  ;;  %v1248_v43 = vsel %vm1120_vm11, 0.0, %v1184_v39  ;;  %v1313_v20 = vadd.f32 %v1185_v9, %v1057_v62  ;;  %1375 = vst [vmem:[#allocation2 + $0x1a8] sm:$0xff] %v1311_v41  ;;  %vm1122_vm12 = vcmp.eq.s32.totalorder %v1011_v26, %v2638_v8  ;;  %v1063_v58 = vld [vmem:[#allocation2] sm:$0xff]  ;;  %v1066_v2 = vld [vmem:[#allocation2 + $0x148] sm:$0xff]  ;;  %v1064_v22 = vld [vmem:[#allocation2 + $0xf0] sm:$0xff] }
 0x20e   : > { %v1312_v18 = vadd.f32 %v1248_v43, %v1056_v7  ;;  %v1187_v15 = vand.u32 2147483647, %v2537_v19  ;;  %v1250_v54 = vsel %vm1122_vm12, 0.0, %v1186_v53  ;;  %v1188_v16 = vand.u32 2147483647, %v2541_v21  ;;  %v1068_v4 = vld [vmem:[#allocation2 + $0x100] sm:$0xff] }
 0x20f   : > { %1374 = vst [vmem:[#allocation2 + $0x80] sm:$0xff] %v1310_v11  ;;  %1377 = vst [vmem:[#allocation2 + $0x28] sm:$0xff] %v1313_v20  ;;  %v1189_v30 = vand.u32 2147483647, %v2545_v23  ;;  %v1013_v17 = vadd.s32 112, %v2636_v6  ;;  %v1314_v10 = vadd.f32 %v1250_v54, %v1058_v13  ;;  %vm1124_vm13 = vcmp.eq.s32.totalorder %v1012_v57, %v2638_v8  ;;  %v1067_v60 = vld [vmem:[#allocation2 + $0x1d0] sm:$0xff] }
 0x210   : > { %1376 = vst [vmem:[#allocation2 + $0x1b8] sm:$0xff] %v1312_v18  ;;  %v1315_v59 = vadd.f32 %v1187_v15, %v1059_v55  ;;  %v1190_v19 = vand.u32 2147483647, %v2549_v25  ;;  %v1252_v12 = vsel %vm1124_vm13, 0.0, %v1188_v16  ;;  %v1191_v61 = vand.u32 2147483647, %v2553_v27 }
 0x211   : > { %v1317_v33 = vadd.f32 %v1189_v30, %v1061_v47  ;;  %vm1126_vm14 = vcmp.eq.s32.totalorder %v1013_v17, %v2638_v8  ;;  %1378 = vst [vmem:[#allocation2 + $0x1e8] sm:$0xff] %v1314_v10  ;;  %v1316_v21 = vadd.f32 %v1252_v12, %v1060_v45  ;;  %v1014_v63 = vadd.s32 120, %v2636_v6  ;;  %v1069_v51 = vld [vmem:[#allocation2 + $0xc8] sm:$0xff]  ;;  %v1072_v24 = vld [vmem:[#allocation2 + $0x20] sm:$0xff]  ;;  %v1071_v41 = vld [vmem:[#allocation2 + $0x1f8] sm:$0xff] }
 0x212   : > { %1379 = vst [vmem:[#allocation2 + $0xf8] sm:$0xff] %v1315_v59  ;;  %v1254_v23 = vsel %vm1126_vm14, 0.0, %v1190_v19  ;;  %v1192_v14 = vand.u32 2147483647, %v2557_v29  ;;  %v1319_v25 = vadd.f32 %v1191_v61, %v1063_v58  ;;  %v1193_v56 = vand.u32 2147483647, %v2561_v31 }
 0x213   : > { %1381 = vst [vmem:[#allocation2 + $0x30] sm:$0xff] %v1317_v33  ;;  %v1318_v0 = vadd.f32 %v1254_v23, %v1062_v32  ;;  %v1194_v1 = vand.u32 2147483647, %v2439_v34  ;;  %1380 = vst [vmem:[#allocation2 + $0x160] sm:$0xff] %v1316_v21  ;;  %vm1128_vm15 = vcmp.eq.s32.totalorder %v1014_v63, %v2638_v8  ;;  %v1015_v27 = vadd.s32 128, %v2636_v6  ;;  %v1073_v55 = vld [vmem:[#allocation2 + $0x128] sm:$0xff] }
 0x214   : > { %v2706_v3 = vadd.s32 128, %v2638_v8  ;;  %v1195_v29 = vand.u32 2147483647, %v2443_v36  ;;  %1383 = vst [vmem:[#allocation2] sm:$0xff] %v1319_v25  ;;  %v1256_v28 = vsel %vm1128_vm15, 0.0, %v1192_v14  ;;  %v1321_v62 = vadd.f32 %v1193_v56, %v1065_v35  ;;  %v1070_v8 = vld [vmem:[#allocation2 + $0x40] sm:$0xff] }
 0x215   : > { %1382 = vst [vmem:[#allocation2 + $0x1e0] sm:$0xff] %v1318_v0  ;;  %v1322_v37 = vadd.f32 %v1194_v1, %v1066_v2  ;;  %v1196_v31 = vand.u32 2147483647, %v2447_v38  ;;  %v1320_v34 = vadd.f32 %v1256_v28, %v1064_v22  ;;  %v1016_v5 = vadd.s32 136, %v2636_v6  ;;  %v1074_v15 = vld [vmem:[#allocation2 + $0x1a0] sm:$0xff]  ;;  %v1075_v45 = vld [vmem:[#allocation2 + $0x1f0] sm:$0xff] }
 0x216   : > { %vm1131_vm0 = vcmp.eq.s32.totalorder %v1015_v27, %v2706_v3  ;;  %v1197_v39 = vand.u32 2147483647, %v2451_v40  ;;  %1385 = vst [vmem:[#allocation2 + $0x8] sm:$0xff] %v1321_v62  ;;  %v1198_v7 = vand.u32 2147483647, %v2455_v42  ;;  %v1017_v9 = vadd.s32 144, %v2636_v6 }
 0x217   : > { %1386 = vst [vmem:[#allocation2 + $0x148] sm:$0xff] %v1322_v37  ;;  %v1259_v36 = vsel %vm1131_vm0, 0.0, %v1195_v29  ;;  %v1324_v49 = vadd.f32 %v1196_v31, %v1068_v4  ;;  %1384 = vst [vmem:[#allocation2 + $0xf0] sm:$0xff] %v1320_v34  ;;  %vm1133_vm1 = vcmp.eq.s32.totalorder %v1016_v5, %v2706_v3  ;;  %v1199_v26 = vand.u32 2147483647, %v2459_v44  ;;  %v1076_v47 = vld [vmem:[#allocation2 + $0xe8] sm:$0xff] }
 0x218   : > { %v1323_v38 = vadd.f32 %v1259_v36, %v1067_v60  ;;  %v1200_v40 = vand.u32 2147483647, %v2463_v46  ;;  %v1261_v11 = vsel %vm1133_vm1, 0.0, %v1197_v39  ;;  %v1326_v43 = vadd.f32 %v1198_v7, %v1070_v8  ;;  %v2919_v30 = vld [vmem:[#allocation21_spill] sm:$0xff]  ;;  %v1077_v32 = vld [vmem:[#allocation2 + $0x78] sm:$0xff]  ;;  %v1078_v58 = vld [vmem:[#allocation2 + $0x70] sm:$0xff] }
 0x219   : > { %1388 = vst [vmem:[#allocation2 + $0x100] sm:$0xff] %v1324_v49  ;;  %vm1135_vm2 = vcmp.eq.s32.totalorder %v1017_v9, %v2706_v3  ;;  %v1018_v20 = vadd.s32 152, %v2636_v6  ;;  %v1325_v42 = vadd.f32 %v1261_v11, %v1069_v51  ;;  %v1201_v18 = vand.u32 2147483647, %v2467_v48  ;;  %v2921_v61 = vld [vmem:[#allocation23_spill] sm:$0xff]  ;;  %v2922_v14 = vld [vmem:[#allocation24_spill] sm:$0xff] }
 0x21a   : > { %1387 = vst [vmem:[#allocation2 + $0x1d0] sm:$0xff] %v1323_v38  ;;  %v1263_v13 = vsel %vm1135_vm2, 0.0, %v1199_v26  ;;  %v1328_v53 = vadd.f32 %v1200_v40, %v1072_v24  ;;  %1390 = vst [vmem:[#allocation2 + $0x40] sm:$0xff] %v1326_v43  ;;  %v1202_v44 = vand.u32 2147483647, %v2471_v50  ;;  %v1019_v46 = vadd.s32 160, %v2636_v6 }
 0x21b   : > { %v1327_v57 = vadd.f32 %v1263_v13, %v1071_v41  ;;  %vm1137_vm3 = vcmp.eq.s32.totalorder %v1018_v20, %v2706_v3  ;;  %1389 = vst [vmem:[#allocation2 + $0xc8] sm:$0xff] %v1325_v42  ;;  %v1203_v16 = vand.u32 2147483647, %v2475_v52  ;;  %v1204_v17 = vand.u32 2147483647, %v2919_v30  ;;  %v2920_v50 = vld [vmem:[#allocation22_spill] sm:$0xff] }
 0x21c   : > { %1392 = vst [vmem:[#allocation2 + $0x20] sm:$0xff] %v1328_v53  ;;  %v1265_v54 = vsel %vm1137_vm3, 0.0, %v1201_v18  ;;  %v1020_v48 = vadd.s32 168, %v2636_v6  ;;  %v1330_v59 = vadd.f32 %v1202_v44, %v1074_v15  ;;  %vm1139_vm4 = vcmp.eq.s32.totalorder %v1019_v46, %v2706_v3  ;;  %v1080_v2 = vld [vmem:[#allocation2 + $0x1d8] sm:$0xff]  ;;  %v1079_v22 = vld [vmem:[#allocation2 + $0x90] sm:$0xff]  ;;  %v2923_v56 = vld [vmem:[#allocation25_spill] sm:$0xff] }
 0x21d   : > { %1391 = vst [vmem:[#allocation2 + $0x1f8] sm:$0xff] %v1327_v57  ;;  %v1329_v10 = vadd.f32 %v1265_v54, %v1073_v55  ;;  %v1205_v19 = vand.u32 2147483647, %v2920_v50  ;;  %v1267_v12 = vsel %vm1139_vm4, 0.0, %v1203_v16  ;;  %v1332_v33 = vadd.f32 %v1204_v17, %v1076_v47  ;;  %v1082_v29 = vld [vmem:[#allocation2 + $0xb8] sm:$0xff]  ;;  %v1081_v4 = vld [vmem:[#allocation2 + $0xd0] sm:$0xff] }
 0x21e   : > { %vm1141_vm5 = vcmp.eq.s32.totalorder %v1020_v48, %v2706_v3  ;;  %v1206_v21 = vand.u32 2147483647, %v2921_v61  ;;  %1394 = vst [vmem:[#allocation2 + $0x1a0] sm:$0xff] %v1330_v59  ;;  %v1331_v52 = vadd.f32 %v1267_v12, %v1075_v45  ;;  %v1021_v63 = vadd.s32 176, %v2636_v6  ;;  %v2924_v28 = vld [vmem:[#allocation26_spill] sm:$0xff]  ;;  %v2925_v37 = vld [vmem:[#allocation27_spill] sm:$0xff] }
 0x21f   : > { %1393 = vst [vmem:[#allocation2 + $0x128] sm:$0xff] %v1329_v10  ;;  %v1269_v23 = vsel %vm1141_vm5, 0.0, %v1205_v19  ;;  %v1207_v35 = vand.u32 2147483647, %v2922_v14  ;;  %1396 = vst [vmem:[#allocation2 + $0xe8] sm:$0xff] %v1332_v33  ;;  %v1022_v27 = vadd.s32 184, %v2636_v6 }
 0x220   : > { %v1333_v0 = vadd.f32 %v1269_v23, %v1077_v32  ;;  %v1334_v25 = vadd.f32 %v1206_v21, %v1078_v58  ;;  %v1208_v1 = vand.u32 2147483647, %v2923_v56  ;;  %1395 = vst [vmem:[#allocation2 + $0x1f0] sm:$0xff] %v1331_v52  ;;  %vm1143_vm6 = vcmp.eq.s32.totalorder %v1021_v63, %v2706_v3  ;;  %v1083_v39 = vld [vmem:[#allocation2 + $0x88] sm:$0xff]  ;;  %v2926_v8 = vld [vmem:[#allocation28_spill] sm:$0xff]  ;;  %v2927_v41 = vld [vmem:[#allocation29_spill] sm:$0xff] }
 0x221   : > { %v1209_v62 = vand.u32 2147483647, %v2924_v28  ;;  %v1210_v60 = vand.u32 2147483647, %v2925_v37  ;;  %v1023_v31 = vadd.s32 192, %v2636_v6  ;;  %v1271_v34 = vsel %vm1143_vm6, 0.0, %v1207_v35 }
 0x222   : > { %1397 = vst [vmem:[#allocation2 + $0x78] sm:$0xff] %v1333_v0  ;;  %1398 = vst [vmem:[#allocation2 + $0x70] sm:$0xff] %v1334_v25  ;;  %v1336_v5 = vadd.f32 %v1208_v1, %v1080_v2  ;;  %vm1145_vm7 = vcmp.eq.s32.totalorder %v1022_v27, %v2706_v3  ;;  %v1211_v36 = vand.u32 2147483647, %v2926_v8  ;;  %v1335_v49 = vadd.f32 %v1271_v34, %v1079_v22  ;;  %v1084_v9 = vld [vmem:[#allocation2 + $0xa8] sm:$0xff]  ;;  %v1086_v43 = vld [vmem:[#allocation2 + $0x170] sm:$0xff] }
 0x223   : > { %v1273_v51 = vsel %vm1145_vm7, 0.0, %v1209_v62  ;;  %v1338_v7 = vadd.f32 %v1210_v60, %v1082_v29  ;;  %vm1147_vm8 = vcmp.eq.s32.totalorder %v1023_v31, %v2706_v3  ;;  %v1212_v26 = vand.u32 2147483647, %v2927_v41  ;;  %v1085_v11 = vld [vmem:[#allocation2 + $0x1c8] sm:$0xff]  ;;  %v2929_v53 = vld [vmem:[#allocation31_spill] sm:$0xff]  ;;  %v1087_v44 = vld [vmem:[#allocation2 + $0x178] sm:$0xff] }
 0x224   : > { %1400 = vst [vmem:[#allocation2 + $0x1d8] sm:$0xff] %v1336_v5  ;;  %v1337_v24 = vadd.f32 %v1273_v51, %v1081_v4  ;;  %v1275_v38 = vsel %vm1147_vm8, 0.0, %v1211_v36  ;;  %v1024_v40 = vadd.s32 200, %v2636_v6  ;;  %1399 = vst [vmem:[#allocation2 + $0x90] sm:$0xff] %v1335_v49  ;;  %v2928_v42 = vld [vmem:[#allocation30_spill] sm:$0xff]  ;;  %v1025_v18 = vadd.s32 208, %v2636_v6 }
 0x225   : > { %1402 = vst [vmem:[#allocation2 + $0xb8] sm:$0xff] %v1338_v7  ;;  %v1339_v20 = vadd.f32 %v1275_v38, %v1083_v39  ;;  %v1213_v13 = vand.u32 2147483647, %v2928_v42  ;;  %v1214_v55 = vand.u32 2147483647, %v2929_v53  ;;  %v1088_v15 = vld [vmem:[#allocation2 + $0x68] sm:$0xff]  ;;  %v1340_v57 = vadd.f32 %v1212_v26, %v1084_v9 }
 0x226   : > { %1401 = vst [vmem:[#allocation2 + $0xd0] sm:$0xff] %v1337_v24  ;;  %vm1149_vm9 = vcmp.eq.s32.totalorder %v1024_v40, %v2706_v3  ;;  %v2930_v46 = vld [vmem:[#allocation32_spill] sm:$0xff]  ;;  %v2931_v47 = vld [vmem:[#allocation33_spill] sm:$0xff]  ;;  %vm1151_vm10 = vcmp.eq.s32.totalorder %v1025_v18, %v2706_v3  ;;  %v1026_v17 = vadd.s32 216, %v2636_v6  ;;  %v1089_v32 = vld [vmem:[#allocation2 + $0x190] sm:$0xff]  ;;  %v1027_v21 = vadd.s32 224, %v2636_v6 }
 0x227   : > { %v1215_v45 = vand.u32 2147483647, %v2930_v46  ;;  %v1216_v54 = vand.u32 2147483647, %v2931_v47  ;;  %1403 = vst [vmem:[#allocation2 + $0x88] sm:$0xff] %v1339_v20  ;;  %v1277_v16 = vsel %vm1149_vm9, 0.0, %v1213_v13  ;;  %v1342_v30 = vadd.f32 %v1214_v55, %v1086_v43 }
 0x228   : > { %1404 = vst [vmem:[#allocation2 + $0xa8] sm:$0xff] %v1340_v57  ;;  %v1341_v48 = vadd.f32 %v1277_v16, %v1085_v11  ;;  %v2932_v50 = vld [vmem:[#allocation34_spill] sm:$0xff]  ;;  %v1090_v58 = vld [vmem:[#allocation2 + $0x198] sm:$0xff]  ;;  %vm1153_vm11 = vcmp.eq.s32.totalorder %v1026_v17, %v2706_v3  ;;  %v2933_v33 = vld [vmem:[#allocation35_spill] sm:$0xff]  ;;  %v1028_v25 = vadd.s32 232, %v2636_v6  ;;  %vm1155_vm12 = vcmp.eq.s32.totalorder %v1027_v21, %v2706_v3 }
 0x229   : > { %v1279_v10 = vsel %vm1151_vm10, 0.0, %v1215_v45  ;;  %v1344_v59 = vadd.f32 %v1216_v54, %v1088_v15  ;;  %v1217_v19 = vand.u32 2147483647, %v2932_v50  ;;  %1406 = vst [vmem:[#allocation2 + $0x170] sm:$0xff] %v1342_v30  ;;  %v1218_v61 = vand.u32 2147483647, %v2933_v33 }
 0x22a   : > { %v1343_v12 = vadd.f32 %v1279_v10, %v1087_v44  ;;  %v1091_v52 = vld [vmem:[#allocation2 + $0x38] sm:$0xff]  ;;  %v1092_v23 = vld [vmem:[#allocation2 + $0xc0] sm:$0xff]  ;;  %1405 = vst [vmem:[#allocation2 + $0x1c8] sm:$0xff] %v1341_v48  ;;  %v2936_v27 = vld [vmem:[#allocation38_spill] sm:$0xff]  ;;  %vm1157_vm13 = vcmp.eq.s32.totalorder %v1028_v25, %v2706_v3  ;;  %v1029_v5 = vadd.s32 240, %v2636_v6  ;;  %v1030_v38 = vadd.s32 248, %v2636_v6 }
 0x22b   : > { %1408 = vst [vmem:[#allocation2 + $0x68] sm:$0xff] %v1344_v59  ;;  %v1281_v63 = vsel %vm1153_vm11, 0.0, %v1217_v19  ;;  %v2934_v14 = vld [vmem:[#allocation36_spill] sm:$0xff]  ;;  %v2935_v2 = vld [vmem:[#allocation37_spill] sm:$0xff]  ;;  %v1346_v56 = vadd.f32 %v1218_v61, %v1090_v58  ;;  %v1221_v29 = vand.u32 2147483647, %v2936_v27 }
 0x22c   : > { %v1219_v35 = vand.u32 2147483647, %v2934_v14  ;;  %v1220_v0 = vand.u32 2147483647, %v2935_v2  ;;  %1407 = vst [vmem:[#allocation2 + $0x178] sm:$0xff] %v1343_v12  ;;  %v1345_v22 = vadd.f32 %v1281_v63, %v1089_v32  ;;  %v1093_v1 = vld [vmem:[#allocation2 + $0x1c0] sm:$0xff]  ;;  %vm1159_vm14 = vcmp.eq.s32.totalorder %v1029_v5, %v2706_v3 }
 0x22d   : > { %v1094_v4 = vld [vmem:[#allocation2 + $0x158] sm:$0xff]  ;;  %v2937_v37 = vld [vmem:[#allocation39_spill] sm:$0xff]  ;;  %1410 = vst [vmem:[#allocation2 + $0x198] sm:$0xff] %v1346_v56  ;;  %v1285_v34 = vsel %vm1157_vm13, 0.0, %v1221_v29  ;;  %v2939_v9 = vld [vmem:[#allocation41_spill] sm:$0xff]  ;;  %vm1161_vm15 = vcmp.eq.s32.totalorder %v1030_v38, %v2706_v3 }
 0x22e   : > { %v1283_v28 = vsel %vm1155_vm12, 0.0, %v1219_v35  ;;  %v1348_v62 = vadd.f32 %v1220_v0, %v1092_v23  ;;  %v1222_v60 = vand.u32 2147483647, %v2937_v37  ;;  %1409 = vst [vmem:[#allocation2 + $0x190] sm:$0xff] %v1345_v22  ;;  %v2938_v39 = vld [vmem:[#allocation40_spill] sm:$0xff]  ;;  %v1349_v49 = vadd.f32 %v1285_v34, %v1093_v1  ;;  %v1095_v7 = vld [vmem:[#allocation2 + $0x10] sm:$0xff] }
 0x22f   : > { %v1347_v31 = vadd.f32 %v1283_v28, %v1091_v52  ;;  %v1223_v8 = vand.u32 2147483647, %v2938_v39  ;;  %v1096_v36 = vld [vmem:[#allocation2 + $0x58] sm:$0xff]  ;;  %v1224_v24 = vand.u32 2147483647, %v2939_v9  ;;  %v1097_v41 = vld [vmem:[#allocation2 + $0xa0] sm:$0xff] }
 0x230   : > { %1412 = vst [vmem:[#allocation2 + $0xc0] sm:$0xff] %v1348_v62  ;;  %v1350_v51 = vadd.f32 %v1222_v60, %v1094_v4  ;;  %v2940_v26 = vld [vmem:[#allocation42_spill] sm:$0xff]  ;;  %1413 = vst [vmem:[#allocation2 + $0x1c0] sm:$0xff] %v1349_v49 }
 0x231   : > { %1411 = vst [vmem:[#allocation2 + $0x38] sm:$0xff] %v1347_v31  ;;  %v1225_v40 = vand.u32 2147483647, %v2940_v26  ;;  %v1287_v11 = vsel %vm1159_vm14, 0.0, %v1223_v8  ;;  %v1352_v43 = vadd.f32 %v1224_v24, %v1096_v36 }
 0x232   : > { %1414 = vst [vmem:[#allocation2 + $0x158] sm:$0xff] %v1350_v51  ;;  %v1351_v20 = vadd.f32 %v1287_v11, %v1095_v7 }
 0x233   : > { %v1289_v42 = vsel %vm1161_vm15, 0.0, %v1225_v40  ;;  %1416 = vst [vmem:[#allocation2 + $0x58] sm:$0xff] %v1352_v43 }
 0x234   : > { %v1353_v13 = vadd.f32 %v1289_v42, %v1097_v41  ;;  %1415 = vst [vmem:[#allocation2 + $0x10] sm:$0xff] %v1351_v20 }
 0x236   : > { %1417 = vst [vmem:[#allocation2 + $0xa0] sm:$0xff] %v1353_v13 }
 0x237 PF: > { %p1727_p10 = scmp.ne.s32.totalorder %s2106_s15, 1 }
 0x239   : > { %1421 = sbr.rel (%p1727_p10) target bundleno = 904 (0x388), region = 52 }
 0x23e   : > { %v1422_v6 = vld [vmem:[#allocation2 + $0xb0] sm:$0xff]  ;;  %v1424_v55 = vld [vmem:[#allocation2 + $0xd8] sm:$0xff]  ;;  %v1427_v45 = vld [vmem:[#allocation2 + $0x168] sm:$0xff] }
 0x23f   : > { %v1423_v53 = vld [vmem:[#allocation2 + $0x1b0] sm:$0xff]  ;;  %v1425_v15 = vld [vmem:[#allocation2 + $0x18] sm:$0xff]  ;;  %v1429_v16 = vld [vmem:[#allocation2 + $0x48] sm:$0xff] }
 0x240   : > { %v1486_v18 = vadd.f32 %v1423_v53, %v1422_v6  ;;  %v1426_v44 = vld [vmem:[#allocation2 + $0x50] sm:$0xff]  ;;  %v1430_v17 = vld [vmem:[#allocation2 + $0x180] sm:$0xff]  ;;  %v1432_v32 = vld [vmem:[#allocation2 + $0x118] sm:$0xff] }
 0x241   : > { %v1428_v47 = vld [vmem:[#allocation2 + $0x130] sm:$0xff]  ;;  %v1433_v19 = vld [vmem:[#allocation2 + $0x98] sm:$0xff]  ;;  %v1434_v12 = vld [vmem:[#allocation2 + $0x120] sm:$0xff] }
 0x242   : > { %v1487_v57 = vadd.f32 %v1486_v18, %v1424_v55  ;;  %v1431_v10 = vld [vmem:[#allocation2 + $0x110] sm:$0xff]  ;;  %v1436_v52 = vld [vmem:[#allocation2 + $0x108] sm:$0xff]  ;;  %v1437_v63 = vld [vmem:[#allocation2 + $0x60] sm:$0xff] }
 0x243   : > { %v1435_v61 = vld [vmem:[#allocation2 + $0x150] sm:$0xff]  ;;  %v1438_v35 = vld [vmem:[#allocation2 + $0xe0] sm:$0xff]  ;;  %v1439_v0 = vld [vmem:[#allocation2 + $0x188] sm:$0xff] }
 0x244   : > { %v1488_v46 = vadd.f32 %v1487_v57, %v1425_v15  ;;  %v1440_v22 = vld [vmem:[#allocation2 + $0x138] sm:$0xff]  ;;  %v1441_v1 = vld [vmem:[#allocation2 + $0x140] sm:$0xff]  ;;  %v1443_v28 = vld [vmem:[#allocation2 + $0x1a8] sm:$0xff] }
 0x245   : > { %v1442_v29 = vld [vmem:[#allocation2 + $0x80] sm:$0xff]  ;;  %v1444_v37 = vld [vmem:[#allocation2 + $0x1b8] sm:$0xff]  ;;  %v1445_v31 = vld [vmem:[#allocation2 + $0x28] sm:$0xff] }
 0x246   : > { %v1489_v3 = vadd.f32 %v1488_v46, %v1426_v44  ;;  %v1446_v5 = vld [vmem:[#allocation2 + $0x1e8] sm:$0xff]  ;;  %v1447_v8 = vld [vmem:[#allocation2 + $0xf8] sm:$0xff]  ;;  %v1448_v49 = vld [vmem:[#allocation2 + $0x160] sm:$0xff] }
 0x247   : > { %v1449_v7 = vld [vmem:[#allocation2 + $0x30] sm:$0xff]  ;;  %v1450_v24 = vld [vmem:[#allocation2 + $0x1e0] sm:$0xff]  ;;  %v1453_v43 = vld [vmem:[#allocation2 + $0x8] sm:$0xff] }
 0x248   : > { %v1490_v54 = vadd.f32 %v1489_v3, %v1427_v45  ;;  %v1451_v41 = vld [vmem:[#allocation2] sm:$0xff]  ;;  %v1452_v40 = vld [vmem:[#allocation2 + $0xf0] sm:$0xff]  ;;  %v1454_v42 = vld [vmem:[#allocation2 + $0x148] sm:$0xff] }
 0x249   : > { %v1455_v6 = vld [vmem:[#allocation2 + $0x1d0] sm:$0xff]  ;;  %v1456_v55 = vld [vmem:[#allocation2 + $0x100] sm:$0xff]  ;;  %v1457_v15 = vld [vmem:[#allocation2 + $0xc8] sm:$0xff] }
 0x24a   : > { %v1491_v30 = vadd.f32 %v1490_v54, %v1428_v47  ;;  %v1458_v44 = vld [vmem:[#allocation2 + $0x40] sm:$0xff]  ;;  %v1459_v45 = vld [vmem:[#allocation2 + $0x1f8] sm:$0xff] }
 0x24b   : > { %v1460_v47 = vld [vmem:[#allocation2 + $0x20] sm:$0xff] }
 0x24c   : > { %v1492_v48 = vadd.f32 %v1491_v30, %v1429_v16  ;;  %v1461_v16 = vld [vmem:[#allocation2 + $0x128] sm:$0xff] }
 0x24e   : > { %v1493_v59 = vadd.f32 %v1492_v48, %v1430_v17  ;;  %v1462_v17 = vld [vmem:[#allocation2 + $0x1a0] sm:$0xff] }
 0x250   : > { %v1494_v50 = vadd.f32 %v1493_v59, %v1431_v10  ;;  %v1463_v10 = vld [vmem:[#allocation2 + $0x1f0] sm:$0xff] }
 0x252   : > { %v1495_v58 = vadd.f32 %v1494_v50, %v1432_v32  ;;  %v1464_v32 = vld [vmem:[#allocation2 + $0xe8] sm:$0xff] }
 0x254   : > { %v1496_v33 = vadd.f32 %v1495_v58, %v1433_v19  ;;  %v1465_v19 = vld [vmem:[#allocation2 + $0x78] sm:$0xff] }
 0x256   : > { %v1497_v21 = vadd.f32 %v1496_v33, %v1434_v12  ;;  %v1466_v12 = vld [vmem:[#allocation2 + $0x70] sm:$0xff] }
 0x258   : > { %v1498_v23 = vadd.f32 %v1497_v21, %v1435_v61  ;;  %v1467_v61 = vld [vmem:[#allocation2 + $0x90] sm:$0xff] }
 0x25a   : > { %v1499_v14 = vadd.f32 %v1498_v23, %v1436_v52  ;;  %v1468_v52 = vld [vmem:[#allocation2 + $0x1d8] sm:$0xff] }
 0x25c   : > { %v1500_v2 = vadd.f32 %v1499_v14, %v1437_v63  ;;  %v1469_v63 = vld [vmem:[#allocation2 + $0xd0] sm:$0xff] }
 0x25e   : > { %v1501_v25 = vadd.f32 %v1500_v2, %v1438_v35  ;;  %v1470_v35 = vld [vmem:[#allocation2 + $0xb8] sm:$0xff] }
 0x260   : > { %v1502_v56 = vadd.f32 %v1501_v25, %v1439_v0  ;;  %v1471_v0 = vld [vmem:[#allocation2 + $0x88] sm:$0xff] }
 0x262   : > { %v1503_v27 = vadd.f32 %v1502_v56, %v1440_v22  ;;  %v1472_v22 = vld [vmem:[#allocation2 + $0xa8] sm:$0xff] }
 0x264   : > { %v1504_v4 = vadd.f32 %v1503_v27, %v1441_v1  ;;  %v1473_v1 = vld [vmem:[#allocation2 + $0x1c8] sm:$0xff] }
 0x266   : > { %v1505_v62 = vadd.f32 %v1504_v4, %v1442_v29  ;;  %v1474_v29 = vld [vmem:[#allocation2 + $0x170] sm:$0xff] }
 0x268   : > { %v1506_v60 = vadd.f32 %v1505_v62, %v1443_v28  ;;  %v1475_v28 = vld [vmem:[#allocation2 + $0x178] sm:$0xff] }
 0x26a   : > { %v1507_v34 = vadd.f32 %v1506_v60, %v1444_v37  ;;  %v1476_v37 = vld [vmem:[#allocation2 + $0x68] sm:$0xff] }
 0x26c   : > { %v1508_v39 = vadd.f32 %v1507_v34, %v1445_v31  ;;  %v1477_v31 = vld [vmem:[#allocation2 + $0x190] sm:$0xff] }
 0x26e   : > { %v1509_v36 = vadd.f32 %v1508_v39, %v1446_v5  ;;  %v1478_v5 = vld [vmem:[#allocation2 + $0x198] sm:$0xff] }
 0x270   : > { %v1510_v51 = vadd.f32 %v1509_v36, %v1447_v8  ;;  %v1479_v8 = vld [vmem:[#allocation2 + $0x38] sm:$0xff] }
 0x272   : > { %v1511_v9 = vadd.f32 %v1510_v51, %v1448_v49  ;;  %v1480_v49 = vld [vmem:[#allocation2 + $0xc0] sm:$0xff] }
 0x274   : > { %v1512_v38 = vadd.f32 %v1511_v9, %v1449_v7  ;;  %v1481_v7 = vld [vmem:[#allocation2 + $0x1c0] sm:$0xff] }
 0x276   : > { %v1513_v26 = vadd.f32 %v1512_v38, %v1450_v24  ;;  %v1482_v24 = vld [vmem:[#allocation2 + $0x158] sm:$0xff] }
 0x278   : > { %v1514_v11 = vadd.f32 %v1513_v26, %v1451_v41  ;;  %v1483_v41 = vld [vmem:[#allocation2 + $0x10] sm:$0xff] }
 0x27a   : > { %v1515_v20 = vadd.f32 %v1514_v11, %v1452_v40  ;;  %v1484_v40 = vld [vmem:[#allocation2 + $0x58] sm:$0xff] }
 0x27c   : > { %v1516_v13 = vadd.f32 %v1515_v20, %v1453_v43  ;;  %v1485_v43 = vld [vmem:[#allocation2 + $0xa0] sm:$0xff] }
 0x27e   : > { %v1517_v53 = vadd.f32 %v1516_v13, %v1454_v42 }
 0x280   : > { %v1518_v18 = vadd.f32 %v1517_v53, %v1455_v6 }
 0x282   : > { %v1519_v57 = vadd.f32 %v1518_v18, %v1456_v55 }
 0x284   : > { %v1520_v46 = vadd.f32 %v1519_v57, %v1457_v15 }
 0x286   : > { %v1521_v3 = vadd.f32 %v1520_v46, %v1458_v44 }
 0x288   : > { %v1522_v54 = vadd.f32 %v1521_v3, %v1459_v45 }
 0x28a   : > { %v1523_v30 = vadd.f32 %v1522_v54, %v1460_v47 }
 0x28c   : > { %v1524_v48 = vadd.f32 %v1523_v30, %v1461_v16 }
 0x28e   : > { %v1525_v59 = vadd.f32 %v1524_v48, %v1462_v17 }
 0x290   : > { %v1526_v50 = vadd.f32 %v1525_v59, %v1463_v10 }
 0x292   : > { %v1527_v58 = vadd.f32 %v1526_v50, %v1464_v32 }
 0x294   : > { %v1528_v33 = vadd.f32 %v1527_v58, %v1465_v19 }
 0x296   : > { %v1529_v21 = vadd.f32 %v1528_v33, %v1466_v12 }
 0x298   : > { %v1530_v23 = vadd.f32 %v1529_v21, %v1467_v61 }
 0x29a   : > { %v1531_v14 = vadd.f32 %v1530_v23, %v1468_v52 }
 0x29c   : > { %v1532_v2 = vadd.f32 %v1531_v14, %v1469_v63 }
 0x29e   : > { %v1533_v25 = vadd.f32 %v1532_v2, %v1470_v35 }
 0x2a0   : > { %v1534_v56 = vadd.f32 %v1533_v25, %v1471_v0 }
 0x2a2   : > { %v1535_v27 = vadd.f32 %v1534_v56, %v1472_v22 }
 0x2a4   : > { %v1536_v4 = vadd.f32 %v1535_v27, %v1473_v1 }
 0x2a6   : > { %v1537_v62 = vadd.f32 %v1536_v4, %v1474_v29 }
 0x2a8   : > { %v1538_v60 = vadd.f32 %v1537_v62, %v1475_v28 }
 0x2aa   : > { %v1539_v34 = vadd.f32 %v1538_v60, %v1476_v37 }
 0x2ac   : > { %v1540_v39 = vadd.f32 %v1539_v34, %v1477_v31 }
 0x2ae   : > { %v1541_v36 = vadd.f32 %v1540_v39, %v1478_v5 }
 0x2b0   : > { %v1542_v51 = vadd.f32 %v1541_v36, %v1479_v8 }
 0x2b2   : > { %v1543_v9 = vadd.f32 %v1542_v51, %v1480_v49 }
 0x2b4   : > { %v1544_v38 = vadd.f32 %v1543_v9, %v1481_v7 }
 0x2b6   : > { %v1545_v26 = vadd.f32 %v1544_v38, %v1482_v24 }
 0x2b8   : > { %v1546_v11 = vadd.f32 %v1545_v26, %v1483_v41 }
 0x2ba   : > { %v1547_v20 = vadd.f32 %v1546_v11, %v1484_v40 }
 0x2bc   : > { %v1548_v42 = vadd.f32 %v1547_v20, %v1485_v43 }
 0x2be   : > { %1549 = vadd.xlane.f32.xlu0 %v1548_v42 }
 0x347   : > { %v1550_v13 = vpop.xlane.xlu0 %1549 }
 0x348   : > { %v1551_v6 = vrot.slane %v1550_v13, 4 }
 0x34a   : > { %v1552_v53 = vadd.f32 %v1551_v6, %v1550_v13 }
 0x34c   : > { %v1553_v55 = vrot.slane %v1552_v53, 2 }
 0x34e   : > { %v1554_v18 = vadd.f32 %v1553_v55, %v1552_v53 }
 0x350   : > { %v1555_v15 = vrot.slane %v1554_v18, 1 }
 0x352   : > { %v1556_v57 = vadd.f32 %v1555_v15, %v1554_v18 }
 0x354   : > { %1798 = vpush %v1556_v57 }
 0x385   : > { %s1799_s15 = spop %1798 }
 0x386   : > { %v1558_v44 = vstv %s1799_s15 }
 0x387   : > { %1559 = vst [vmem:[%s2338_s25] sm:$0xff] %v1558_v44 }
 0x388 PF: > { %s1729_s26 = sshll.u32 %s2110_s16, 7  ;;  %s1574_s29 = sshll.u32 %s2338_s25, 4  ;;  %s1575_s29 = int_to_ptr.vmem [resolvable:$true] %s1574_s29 }
 0x389   : > { %s1572_s4 = scalar_lea.hbm %s2829_s2, %s1729_s26  ;;  %s1561_s7 = scalar_lea.sflag [#allocation5], %s2320_s9 }
 0x38a   : > { %s1998_s30 = scalar_lea.vmem %s1575_s29, 128  ;;  %p2941_p7 = scmp.ne.s32.totalorder %s2852_s27, 0 }
 0x38b   : > { %p1999_p13 = scmp.ne.s32.totalorder %s1575_s29, %s1998_s30  ;;  %s2129_s6 = smov [#allocation8]  }
 0x38c   : > { %s2002_s21 = sshll.u32 %s2129_s6, 4  ;;  %s2003_s21 = int_to_ptr.vmem [resolvable:$false] %s2002_s21 }
 0x38d   : > { %p2000_p12 = pnand %p1999_p13, %p2941_p7  ;;  %s2004_s12 = scalar_lea.vmem %s2003_s21, 256 }
 0x38e   : > { %p2005_p2 = scmp.lt.s32.totalorder %s1575_s29, %s2003_s21  ;;  %p2006_p5 = scmp.lt.s32.totalorder %s2004_s12, %s1998_s30 }
 0x38f   : > { %p2001_p3 = pneg %p2000_p12 }
 0x390   : > { %p2007_p11 = por %p2006_p5, %p2005_p2 }
 0x392   : > { %p2008_p4 = pnand %p2007_p11, %p2001_p3 }
 0x394   : > { %2011 = shalt.err (!%p2008_p4)
}
 0x395   : > { %s2012_s16 = scalar_lea.hbm %s1572_s4, 128  ;;  %s2016_s23 = scalar_lea.hbm %s2829_s2, 256 }
 0x396   : > { %p2013_p1 = scmp.ne.s32.totalorder %s1572_s4, %s2012_s16  ;;  %p2017_p6 = scmp.lt.s32.totalorder %s1572_s4, %s2829_s2 }
 0x397   : > { %p2018_p9 = scmp.lt.s32.totalorder %s2016_s23, %s2012_s16 }
 0x398   : > { %p2014_p0 = pnand %p2013_p1, %p2941_p7 }
 0x399   : > { %p2019_p10 = por %p2018_p9, %p2017_p6 }
 0x39a   : > { %p2015_p8 = pneg %p2014_p0 }
 0x39c   : > { %p2020_p13 = pnand %p2019_p10, %p2015_p8 }
 0x39e   : > { %2023 = shalt.err (!%p2020_p13)
}
 0x39f   : > { %1804 = dma.vmem_to_hbm [thread:$0]  (%p2941_p7), %s1575_s29, 128, %s1572_s4, %s1561_s7  }
 0x3a0 PF: > { %s2942_s25 = sld [smem:[#allocation12_spill]]  ;;  %p1818_p12 = scmp.ge.s32.totalorder %s2122_s19, 2 }
 0x3a1   : > { %s2943_s15 = sld [smem:[#allocation13_spill]] }
 0x3a6   : > { %s1586_s26 = sand.u32 1, %s2942_s25  }
 0x3a7   : > { %p2944_p3 = scmp.ne.s32.totalorder %s2943_s15, 0  ;;  %s1587_s8 = scalar_lea.sflag [#allocation5], %s1586_s26 }
 0x3a9   : > { %p1814_p2 = pnand %p1818_p12, %p2944_p3 }
 0x3ab   : > { %p1815_p5 = pneg %p1814_p2 }
 0x3ad   : > { %2077 = dma.done.wait (%p1815_p5), %s1587_s8, 128  }
 0x3ae   : > { %2079 = vsyncadd (%p1815_p5), %s1587_s8, 4294967168  ;;  %s21_s19 = sadd.s32 1, %s2122_s19   ;;  %s2945_s27 = sld [smem:[#allocation14_spill]] }
 0x3af   : > { %p18_p11 = scmp.ge.s32.totalorder %s21_s19, 6   ;;  %s2946_s9 = smov %s2086_s10 }
 0x3b0   : > { %s2947_s10 = smov %s2090_s11  ;;  %s2948_s11 = smov %s2289_s20 }
 0x3b1   : > { %s2949_s12 = smov %s2098_s13  ;;  %s2950_s13 = smov %s2102_s14 }
 0x3b2   : > { %s2951_s14 = smov %s2297_s22  ;;  %s2952_s15 = smov %s2114_s17 }
 0x3b3   : > { %s2953_s16 = smov %s2118_s18  ;;  %s2955_s18 = smov %s2961_s5 }
 0x3b4   : > { %s2954_s17 = smov %s2945_s27  ;;  %20 = sbr.rel (!%p18_p11) target bundleno = 13 (0xd), region = 102 }
 0x3b9   :  { %1592 = vsyncpa [#allocation4], 1 }
 0x3ba   :  { %1594 = vsyncpa [#allocation4 + $0x1], 1 }
 0x3bb   :  { %1595 = vsyncpa [#allocation7], 1 }
 0x3bc   :  { %1597 = vsyncpa [#allocation7 + $0x1], 1 }
 0x3bd   :  { %1598 = vsyncpa [#allocation5], 1 }
 0x3be   :  { %1600 = vsyncpa [#allocation5 + $0x1], 1 }

</bundles_post_ra>
